<compile_context>
chip_gen: v5e
topology: v5e:2x2
jax: 0.10.0
libtpu: 0.0.40
codegen_flags: <defaults>
</compile_context>

<pallas_src>
import functools

import jax
import jax.numpy as jnp
from jax.experimental import pallas as pl
from jax.experimental.pallas import tpu as pltpu

# ---- Config (synthetic stand-in for the PyTorch `Config`) ----
NUM_FEATURES = 16
NUM_CLASSES = 4
DIM = 32            # Config.TRANSFORMER_DIM
DEPTH = 2           # Config.TRANSFORMER_DEPTH
HEADS = 4           # Config.TRANSFORMER_HEADS
FFN_DIM = 2048      # nn.TransformerEncoderLayer default dim_feedforward
LN_EPS = 1e-5       # nn.TransformerEncoderLayer default layer_norm_eps

CLS_PAD = 128       # pad the logits lane dim to a full vreg width (unmasked vst)
MATMUL_DTYPE = jnp.bfloat16


def _round_up(a, b):
    return (a + b - 1) // b * b


# ----------------------------- fused Pallas kernel -----------------------------

def _fused_forward_kernel(x_ref, *refs, depth):
    """Whole TabTransformer forward on one (tile_m, NUM_FEATURES) row tile.

    refs = [embed_wt, embed_b,
            per layer: attn_wt, attn_b, ln1_g, ln1_b,
                       ffn1_wt, ffn1_b, ffn2_wt, ffn2_b, ln2_g, ln2_b,
            cls1_wt, cls1_b, cls2_wt, cls2_b, cls3_wt, cls3_b,
            o_ref]
    """
    it = iter(refs)
    embed_wt, embed_b = next(it), next(it)
    layers = [tuple(next(it) for _ in range(10)) for _ in range(depth)]
    cls1_wt, cls1_b = next(it), next(it)
    cls2_wt, cls2_b = next(it), next(it)
    cls3_wt, cls3_b = next(it), next(it)
    o_ref = next(it)

    def matmul(a, wt_ref, b_ref):
        # bf16 MXU operands, fp32 accumulation; bias add stays fp32 on the VPU.
        y = jnp.dot(a.astype(MATMUL_DTYPE), wt_ref[...],
                    preferred_element_type=jnp.float32)
        return y + b_ref[...]

    def layernorm(v, g_ref, b_ref):
        mu = jnp.mean(v, axis=-1, keepdims=True)
        var = jnp.mean(jnp.square(v - mu), axis=-1, keepdims=True)   # biased, like PyTorch
        return (v - mu) * jax.lax.rsqrt(var + LN_EPS) * g_ref[...] + b_ref[...]

    h = matmul(x_ref[...], embed_wt, embed_b)                 # (tm, DIM) fp32

    for (attn_wt, attn_b, ln1_g, ln1_b,
         ffn1_wt, ffn1_b, ffn2_wt, ffn2_b, ln2_g, ln2_b) in layers:
        # S == 1: softmax over a single key is exactly 1, so MHA(x) == out_proj(V(x)).
        # W_v / W_out (and their biases) were folded offline into attn_wt / attn_b.
        attn = matmul(h, attn_wt, attn_b)
        h = layernorm(h + attn, ln1_g, ln1_b)                 # post-norm; dropout = eval identity
        f = jnp.maximum(matmul(h, ffn1_wt, ffn1_b), 0.0)      # (tm, FFN_DIM) stays in VMEM
        f = matmul(f, ffn2_wt, ffn2_b)
        h = layernorm(h + f, ln2_g, ln2_b)

    # mean over the length-1 sequence dim is the identity.
    c = jnp.maximum(matmul(h, cls1_wt, cls1_b), 0.0)
    c = jnp.maximum(matmul(c, cls2_wt, cls2_b), 0.0)
    o_ref[...] = matmul(c, cls3_wt, cls3_b)                   # (tm, CLS_PAD), lane-dense store


# ------------------------- wrapper / pallas_call glue -------------------------

def _flatten_inference_params(ip):
    arrs = [ip['embed_wt'], ip['embed_b']]
    for lp in ip['layers']:
        arrs += [lp['attn_wt'], lp['attn_b'], lp['ln1_g'], lp['ln1_b'],
                 lp['ffn1_wt'], lp['ffn1_b'], lp['ffn2_wt'], lp['ffn2_b'],
                 lp['ln2_g'], lp['ln2_b']]
    arrs += [ip['cls1_wt'], ip['cls1_b'], ip['cls2_wt'], ip['cls2_b'],
             ip['cls3_wt'], ip['cls3_b']]
    return arrs


@functools.partial(jax.jit, static_argnames=("tile_m",))
def tab_transformer_forward(x, iparams, tile_m=256):
    """x: (B, NUM_FEATURES) fp32 -> logits (B, NUM_CLASSES) fp32."""
    B, F = x.shape
    # Row tile: multiple of 8 sublanes, capped at tile_m (sized for v7x's 64 MiB VMEM).
    tm = min(tile_m, _round_up(B, 8))
    m_pad = _round_up(B, tm)
    xp = x if m_pad == B else jnp.pad(x, ((0, m_pad - B), (0, 0)))

    weights = _flatten_inference_params(iparams)

    in_specs = [pl.BlockSpec((tm, F), lambda i: (i, 0))]
    # Full-array blocks with a constant index_map: fetched once, VMEM-resident.
    in_specs += [pl.BlockSpec(w.shape, lambda i: (0, 0)) for w in weights]

    out = pl.pallas_call(
        functools.partial(_fused_forward_kernel, depth=len(iparams['layers'])),
        out_shape=jax.ShapeDtypeStruct((m_pad, CLS_PAD), jnp.float32),
        grid=(m_pad // tm,),
        in_specs=in_specs,
        out_specs=pl.BlockSpec((tm, CLS_PAD), lambda i: (i, 0)),
        compiler_params=pltpu.CompilerParams(
            dimension_semantics=("parallel",)),   # megacore sharding on v7x
    )(xp, *weights)

    return out[:B, :NUM_CLASSES]


# ------------------------------ parameter init ------------------------------

def _dense(key, out_f, in_f):
    kw, kb = jax.random.split(key)
    bound = 1.0 / float(in_f) ** 0.5
    w = jax.random.uniform(kw, (out_f, in_f), jnp.float32, -bound, bound)
    b = jax.random.uniform(kb, (out_f,), jnp.float32, -bound, bound)
    return w, b


def init_params(key):
    """PyTorch-layout parameters (W: (out, in)), as the nn.Module would own them."""
    keys = jax.random.split(key, 4 + DEPTH)
    params = {}
    params['embed_w'], params['embed_b'] = _dense(keys[0], DIM, NUM_FEATURES)

    layers = []
    for d in range(DEPTH):
        lk = jax.random.split(keys[1 + d], 4)
        in_proj_w, in_proj_b = _dense(lk[0], 3 * DIM, DIM)
        out_proj_w, out_proj_b = _dense(lk[1], DIM, DIM)
        ffn1_w, ffn1_b = _dense(lk[2], FFN_DIM, DIM)
        ffn2_w, ffn2_b = _dense(lk[3], DIM, FFN_DIM)
        layers.append(dict(
            in_proj_w=in_proj_w, in_proj_b=in_proj_b,
            out_proj_w=out_proj_w, out_proj_b=out_proj_b,
            ln1_g=jnp.ones((DIM,), jnp.float32), ln1_b=jnp.zeros((DIM,), jnp.float32),
            ffn1_w=ffn1_w, ffn1_b=ffn1_b,
            ffn2_w=ffn2_w, ffn2_b=ffn2_b,
            ln2_g=jnp.ones((DIM,), jnp.float32), ln2_b=jnp.zeros((DIM,), jnp.float32),
        ))
    params['layers'] = layers

    params['cls1_w'], params['cls1_b'] = _dense(keys[1 + DEPTH], 256, DIM)
    params['cls2_w'], params['cls2_b'] = _dense(keys[2 + DEPTH], 128, 256)
    params['cls3_w'], params['cls3_b'] = _dense(keys[3 + DEPTH], NUM_CLASSES, 128)
    return params


def prepare_inference_params(params):
    """Offline prep: fold W_v/W_out (S=1 attention), transpose weights once,
    cast matmul weights to bf16, reshape biases/LN params to (1, N) fp32, and
    pad the final classifier to 128 output lanes."""
    def wt(w):                      # (out, in) -> (in, out), bf16 MXU operand
        return jnp.transpose(w).astype(MATMUL_DTYPE)

    def vec(b):                     # (N,) -> (1, N), fp32 (VPU math)
        return b.reshape(1, -1).astype(jnp.float32)

    ip = {'embed_wt': wt(params['embed_w']), 'embed_b': vec(params['embed_b'])}
    layers = []
    for lp in params['layers']:
        w_v = lp['in_proj_w'][2 * DIM:]          # (DIM, DIM)  value projection
        b_v = lp['in_proj_b'][2 * DIM:]          # (DIM,)
        w_eff = lp['out_proj_w'] @ w_v           # (DIM, DIM), PyTorch layout
        b_eff = lp['out_proj_w'] @ b_v + lp['out_proj_b']
        layers.append(dict(
            attn_wt=wt(w_eff), attn_b=vec(b_eff),
            ln1_g=vec(lp['ln1_g']), ln1_b=vec(lp['ln1_b']),
            ffn1_wt=wt(lp['ffn1_w']), ffn1_b=vec(lp['ffn1_b']),
            ffn2_wt=wt(lp['ffn2_w']), ffn2_b=vec(lp['ffn2_b']),
            ln2_g=vec(lp['ln2_g']), ln2_b=vec(lp['ln2_b']),
        ))
    ip['layers'] = layers
    ip['cls1_wt'] = wt(params['cls1_w']); ip['cls1_b'] = vec(params['cls1_b'])
    ip['cls2_wt'] = wt(params['cls2_w']); ip['cls2_b'] = vec(params['cls2_b'])
    # Pad the 4-class head to 128 lanes so the kernel's only HBM store is unmasked.
    w3t = jnp.transpose(params['cls3_w']).astype(MATMUL_DTYPE)   # (128, 4)
    ip['cls3_wt'] = jnp.pad(w3t, ((0, 0), (0, CLS_PAD - NUM_CLASSES)))
    ip['cls3_b'] = jnp.pad(vec(params['cls3_b']), ((0, 0), (0, CLS_PAD - NUM_CLASSES)))
    return ip


# ------------------------------ fp32 reference ------------------------------

def reference_forward(x, params):
    """Pure-JAX fp32 reference using the ORIGINAL (unfolded) parameters."""
    def lin(h, w, b):
        return h @ w.T + b

    def ln(h, g, b):
        mu = h.mean(-1, keepdims=True)
        var = ((h - mu) ** 2).mean(-1, keepdims=True)
        return (h - mu) / jnp.sqrt(var + LN_EPS) * g + b

    h = lin(x, params['embed_w'], params['embed_b'])
    for lp in params['layers']:
        # S == 1: attention weights are softmax over one key == 1 -> output is V.
        w_v = lp['in_proj_w'][2 * DIM:]
        b_v = lp['in_proj_b'][2 * DIM:]
        v = lin(h, w_v, b_v)
        attn = lin(v, lp['out_proj_w'], lp['out_proj_b'])
        h = ln(h + attn, lp['ln1_g'], lp['ln1_b'])
        f = jax.nn.relu(lin(h, lp['ffn1_w'], lp['ffn1_b']))
        f = lin(f, lp['ffn2_w'], lp['ffn2_b'])
        h = ln(h + f, lp['ln2_g'], lp['ln2_b'])
    h = jax.nn.relu(lin(h, params['cls1_w'], params['cls1_b']))
    h = jax.nn.relu(lin(h, params['cls2_w'], params['cls2_b']))
    return lin(h, params['cls3_w'], params['cls3_b'])


if __name__ == "__main__":
    key = jax.random.PRNGKey(0)
    pkey, xkey = jax.random.split(key)
    params = init_params(pkey)
    iparams = prepare_inference_params(params)
    x = jax.random.normal(xkey, (2, NUM_FEATURES), dtype=jnp.float32)

    out = tab_transformer_forward(x, iparams)
    out = jax.block_until_ready(out)

    assert out.shape == (2, NUM_CLASSES), out.shape
    assert bool(jnp.all(jnp.isfinite(out)))

    # Loose tolerance: kernel uses bf16 MXU operands with fp32 accumulation.
    ref = reference_forward(x, params)
    assert bool(jnp.allclose(out, ref, atol=1e-1, rtol=1e-1)), (out, ref)
    print("KERNEL_OK")
</pallas_src>

<mosaic_0001>
module attributes {stable_mosaic.version = 11 : i64} {
  func.func @_fused_forward_kernel(%arg0: i32, %arg1: memref<8x16xf32, #tpu.memory_space<vmem>>, %arg2: memref<16x32xbf16, #tpu.memory_space<vmem>>, %arg3: memref<1x32xf32, #tpu.memory_space<vmem>>, %arg4: memref<32x32xbf16, #tpu.memory_space<vmem>>, %arg5: memref<1x32xf32, #tpu.memory_space<vmem>>, %arg6: memref<1x32xf32, #tpu.memory_space<vmem>>, %arg7: memref<1x32xf32, #tpu.memory_space<vmem>>, %arg8: memref<32x2048xbf16, #tpu.memory_space<vmem>>, %arg9: memref<1x2048xf32, #tpu.memory_space<vmem>>, %arg10: memref<2048x32xbf16, #tpu.memory_space<vmem>>, %arg11: memref<1x32xf32, #tpu.memory_space<vmem>>, %arg12: memref<1x32xf32, #tpu.memory_space<vmem>>, %arg13: memref<1x32xf32, #tpu.memory_space<vmem>>, %arg14: memref<32x32xbf16, #tpu.memory_space<vmem>>, %arg15: memref<1x32xf32, #tpu.memory_space<vmem>>, %arg16: memref<1x32xf32, #tpu.memory_space<vmem>>, %arg17: memref<1x32xf32, #tpu.memory_space<vmem>>, %arg18: memref<32x2048xbf16, #tpu.memory_space<vmem>>, %arg19: memref<1x2048xf32, #tpu.memory_space<vmem>>, %arg20: memref<2048x32xbf16, #tpu.memory_space<vmem>>, %arg21: memref<1x32xf32, #tpu.memory_space<vmem>>, %arg22: memref<1x32xf32, #tpu.memory_space<vmem>>, %arg23: memref<1x32xf32, #tpu.memory_space<vmem>>, %arg24: memref<32x256xbf16, #tpu.memory_space<vmem>>, %arg25: memref<1x256xf32, #tpu.memory_space<vmem>>, %arg26: memref<256x128xbf16, #tpu.memory_space<vmem>>, %arg27: memref<1x128xf32, #tpu.memory_space<vmem>>, %arg28: memref<128x128xbf16, #tpu.memory_space<vmem>>, %arg29: memref<1x128xf32, #tpu.memory_space<vmem>>, %arg30: memref<8x128xf32, #tpu.memory_space<vmem>>) attributes {dimension_semantics = [#tpu.dimension_semantics<parallel>], iteration_bounds = array<i64: 1>, scalar_prefetch = 0 : i64, scratch_operands = 0 : i64, tpu.core_type = #tpu.core_type<tc>, window_params = [{transform_indices = @transform_0, window_bounds = array<i64: 8, 16>}, {pipeline_mode = #tpu.pipeline_mode<synchronous>, transform_indices = @transform_1, window_bounds = array<i64: 16, 32>}, {pipeline_mode = #tpu.pipeline_mode<synchronous>, transform_indices = @transform_2, window_bounds = array<i64: 1, 32>}, {pipeline_mode = #tpu.pipeline_mode<synchronous>, transform_indices = @transform_3, window_bounds = array<i64: 32, 32>}, {pipeline_mode = #tpu.pipeline_mode<synchronous>, transform_indices = @transform_4, window_bounds = array<i64: 1, 32>}, {pipeline_mode = #tpu.pipeline_mode<synchronous>, transform_indices = @transform_5, window_bounds = array<i64: 1, 32>}, {pipeline_mode = #tpu.pipeline_mode<synchronous>, transform_indices = @transform_6, window_bounds = array<i64: 1, 32>}, {pipeline_mode = #tpu.pipeline_mode<synchronous>, transform_indices = @transform_7, window_bounds = array<i64: 32, 2048>}, {pipeline_mode = #tpu.pipeline_mode<synchronous>, transform_indices = @transform_8, window_bounds = array<i64: 1, 2048>}, {pipeline_mode = #tpu.pipeline_mode<synchronous>, transform_indices = @transform_9, window_bounds = array<i64: 2048, 32>}, {pipeline_mode = #tpu.pipeline_mode<synchronous>, transform_indices = @transform_10, window_bounds = array<i64: 1, 32>}, {pipeline_mode = #tpu.pipeline_mode<synchronous>, transform_indices = @transform_11, window_bounds = array<i64: 1, 32>}, {pipeline_mode = #tpu.pipeline_mode<synchronous>, transform_indices = @transform_12, window_bounds = array<i64: 1, 32>}, {pipeline_mode = #tpu.pipeline_mode<synchronous>, transform_indices = @transform_13, window_bounds = array<i64: 32, 32>}, {pipeline_mode = #tpu.pipeline_mode<synchronous>, transform_indices = @transform_14, window_bounds = array<i64: 1, 32>}, {pipeline_mode = #tpu.pipeline_mode<synchronous>, transform_indices = @transform_15, window_bounds = array<i64: 1, 32>}, {pipeline_mode = #tpu.pipeline_mode<synchronous>, transform_indices = @transform_16, window_bounds = array<i64: 1, 32>}, {pipeline_mode = #tpu.pipeline_mode<synchronous>, transform_indices = @transform_17, window_bounds = array<i64: 32, 2048>}, {pipeline_mode = #tpu.pipeline_mode<synchronous>, transform_indices = @transform_18, window_bounds = array<i64: 1, 2048>}, {pipeline_mode = #tpu.pipeline_mode<synchronous>, transform_indices = @transform_19, window_bounds = array<i64: 2048, 32>}, {pipeline_mode = #tpu.pipeline_mode<synchronous>, transform_indices = @transform_20, window_bounds = array<i64: 1, 32>}, {pipeline_mode = #tpu.pipeline_mode<synchronous>, transform_indices = @transform_21, window_bounds = array<i64: 1, 32>}, {pipeline_mode = #tpu.pipeline_mode<synchronous>, transform_indices = @transform_22, window_bounds = array<i64: 1, 32>}, {pipeline_mode = #tpu.pipeline_mode<synchronous>, transform_indices = @transform_23, window_bounds = array<i64: 32, 256>}, {pipeline_mode = #tpu.pipeline_mode<synchronous>, transform_indices = @transform_24, window_bounds = array<i64: 1, 256>}, {pipeline_mode = #tpu.pipeline_mode<synchronous>, transform_indices = @transform_25, window_bounds = array<i64: 256, 128>}, {pipeline_mode = #tpu.pipeline_mode<synchronous>, transform_indices = @transform_26, window_bounds = array<i64: 1, 128>}, {pipeline_mode = #tpu.pipeline_mode<synchronous>, transform_indices = @transform_27, window_bounds = array<i64: 128, 128>}, {pipeline_mode = #tpu.pipeline_mode<synchronous>, transform_indices = @transform_28, window_bounds = array<i64: 1, 128>}, {transform_indices = @transform_29, window_bounds = array<i64: 8, 128>}]} {
    %c0 = arith.constant 0 : index
    %c0_0 = arith.constant 0 : index
    %0 = vector.load %arg1[%c0, %c0_0] : memref<8x16xf32, #tpu.memory_space<vmem>>, vector<8x16xf32>
    %1 = arith.truncf %0 : vector<8x16xf32> to vector<8x16xbf16>
    %c0_1 = arith.constant 0 : index
    %c0_2 = arith.constant 0 : index
    %2 = vector.load %arg2[%c0_1, %c0_2] : memref<16x32xbf16, #tpu.memory_space<vmem>>, vector<16x32xbf16>
    %cst = arith.constant dense<0.000000e+00> : vector<8x32xf32>
    %3 = tpu.matmul %1, %2, %cst {dimension_numbers = #tpu.dot_dimension_numbers<[1], [0], [0], [1], [0, 0, 1, 1], [], []>} : vector<8x16xbf16>, vector<16x32xbf16>, vector<8x32xf32> -> vector<8x32xf32>
    %c0_3 = arith.constant 0 : index
    %c0_4 = arith.constant 0 : index
    %4 = vector.load %arg3[%c0_3, %c0_4] : memref<1x32xf32, #tpu.memory_space<vmem>>, vector<1x32xf32>
    %5 = vector.broadcast %4 : vector<1x32xf32> to vector<8x32xf32>
    %6 = arith.addf %3, %5 : vector<8x32xf32>
    %7 = arith.truncf %6 : vector<8x32xf32> to vector<8x32xbf16>
    %c0_5 = arith.constant 0 : index
    %c0_6 = arith.constant 0 : index
    %8 = vector.load %arg4[%c0_5, %c0_6] : memref<32x32xbf16, #tpu.memory_space<vmem>>, vector<32x32xbf16>
    %cst_7 = arith.constant dense<0.000000e+00> : vector<8x32xf32>
    %9 = tpu.matmul %7, %8, %cst_7 {dimension_numbers = #tpu.dot_dimension_numbers<[1], [0], [0], [1], [0, 0, 1, 1], [], []>} : vector<8x32xbf16>, vector<32x32xbf16>, vector<8x32xf32> -> vector<8x32xf32>
    %c0_8 = arith.constant 0 : index
    %c0_9 = arith.constant 0 : index
    %10 = vector.load %arg5[%c0_8, %c0_9] : memref<1x32xf32, #tpu.memory_space<vmem>>, vector<1x32xf32>
    %11 = vector.broadcast %10 : vector<1x32xf32> to vector<8x32xf32>
    %12 = arith.addf %9, %11 : vector<8x32xf32>
    %13 = arith.addf %6, %12 : vector<8x32xf32>
    %cst_10 = arith.constant dense<0.000000e+00> : vector<8xf32>
    %14 = vector.multi_reduction <add>, %13, %cst_10 [1] : vector<8x32xf32> to vector<8xf32>
    %15 = vector.shape_cast %14 : vector<8xf32> to vector<8x1xf32>
    %cst_11 = arith.constant 3.200000e+01 : f32
    %16 = vector.broadcast %cst_11 : f32 to vector<8x1xf32>
    %17 = arith.divf %15, %16 : vector<8x1xf32>
    %18 = vector.broadcast %17 : vector<8x1xf32> to vector<8x32xf32>
    %19 = arith.subf %13, %18 : vector<8x32xf32>
    %20 = arith.mulf %19, %19 : vector<8x32xf32>
    %cst_12 = arith.constant dense<0.000000e+00> : vector<8xf32>
    %21 = vector.multi_reduction <add>, %20, %cst_12 [1] : vector<8x32xf32> to vector<8xf32>
    %22 = vector.shape_cast %21 : vector<8xf32> to vector<8x1xf32>
    %cst_13 = arith.constant 3.200000e+01 : f32
    %23 = vector.broadcast %cst_13 : f32 to vector<8x1xf32>
    %24 = arith.divf %22, %23 : vector<8x1xf32>
    %25 = vector.broadcast %17 : vector<8x1xf32> to vector<8x32xf32>
    %26 = arith.subf %13, %25 : vector<8x32xf32>
    %cst_14 = arith.constant 9.99999974E-6 : f32
    %27 = vector.broadcast %cst_14 : f32 to vector<8x1xf32>
    %28 = arith.addf %24, %27 : vector<8x1xf32>
    %29 = math.rsqrt %28 : vector<8x1xf32>
    %30 = vector.broadcast %29 : vector<8x1xf32> to vector<8x32xf32>
    %31 = arith.mulf %26, %30 : vector<8x32xf32>
    %c0_15 = arith.constant 0 : index
    %c0_16 = arith.constant 0 : index
    %32 = vector.load %arg6[%c0_15, %c0_16] : memref<1x32xf32, #tpu.memory_space<vmem>>, vector<1x32xf32>
    %33 = vector.broadcast %32 : vector<1x32xf32> to vector<8x32xf32>
    %34 = arith.mulf %31, %33 : vector<8x32xf32>
    %c0_17 = arith.constant 0 : index
    %c0_18 = arith.constant 0 : index
    %35 = vector.load %arg7[%c0_17, %c0_18] : memref<1x32xf32, #tpu.memory_space<vmem>>, vector<1x32xf32>
    %36 = vector.broadcast %35 : vector<1x32xf32> to vector<8x32xf32>
    %37 = arith.addf %34, %36 : vector<8x32xf32>
    %38 = arith.truncf %37 : vector<8x32xf32> to vector<8x32xbf16>
    %c0_19 = arith.constant 0 : index
    %c0_20 = arith.constant 0 : index
    %39 = vector.load %arg8[%c0_19, %c0_20] : memref<32x2048xbf16, #tpu.memory_space<vmem>>, vector<32x2048xbf16>
    %cst_21 = arith.constant dense<0.000000e+00> : vector<8x2048xf32>
    %40 = tpu.matmul %38, %39, %cst_21 {dimension_numbers = #tpu.dot_dimension_numbers<[1], [0], [0], [1], [0, 0, 1, 1], [], []>} : vector<8x32xbf16>, vector<32x2048xbf16>, vector<8x2048xf32> -> vector<8x2048xf32>
    %c0_22 = arith.constant 0 : index
    %c0_23 = arith.constant 0 : index
    %41 = vector.load %arg9[%c0_22, %c0_23] : memref<1x2048xf32, #tpu.memory_space<vmem>>, vector<1x2048xf32>
    %42 = vector.broadcast %41 : vector<1x2048xf32> to vector<8x2048xf32>
    %43 = arith.addf %40, %42 : vector<8x2048xf32>
    %cst_24 = arith.constant 0.000000e+00 : f32
    %44 = vector.broadcast %cst_24 : f32 to vector<8x2048xf32>
    %45 = arith.maximumf %43, %44 : vector<8x2048xf32>
    %46 = arith.truncf %45 : vector<8x2048xf32> to vector<8x2048xbf16>
    %c0_25 = arith.constant 0 : index
    %c0_26 = arith.constant 0 : index
    %47 = vector.load %arg10[%c0_25, %c0_26] : memref<2048x32xbf16, #tpu.memory_space<vmem>>, vector<2048x32xbf16>
    %cst_27 = arith.constant dense<0.000000e+00> : vector<8x32xf32>
    %48 = tpu.matmul %46, %47, %cst_27 {dimension_numbers = #tpu.dot_dimension_numbers<[1], [0], [0], [1], [0, 0, 1, 1], [], []>} : vector<8x2048xbf16>, vector<2048x32xbf16>, vector<8x32xf32> -> vector<8x32xf32>
    %c0_28 = arith.constant 0 : index
    %c0_29 = arith.constant 0 : index
    %49 = vector.load %arg11[%c0_28, %c0_29] : memref<1x32xf32, #tpu.memory_space<vmem>>, vector<1x32xf32>
    %50 = vector.broadcast %49 : vector<1x32xf32> to vector<8x32xf32>
    %51 = arith.addf %48, %50 : vector<8x32xf32>
    %52 = arith.addf %37, %51 : vector<8x32xf32>
    %cst_30 = arith.constant dense<0.000000e+00> : vector<8xf32>
    %53 = vector.multi_reduction <add>, %52, %cst_30 [1] : vector<8x32xf32> to vector<8xf32>
    %54 = vector.shape_cast %53 : vector<8xf32> to vector<8x1xf32>
    %cst_31 = arith.constant 3.200000e+01 : f32
    %55 = vector.broadcast %cst_31 : f32 to vector<8x1xf32>
    %56 = arith.divf %54, %55 : vector<8x1xf32>
    %57 = vector.broadcast %56 : vector<8x1xf32> to vector<8x32xf32>
    %58 = arith.subf %52, %57 : vector<8x32xf32>
    %59 = arith.mulf %58, %58 : vector<8x32xf32>
    %cst_32 = arith.constant dense<0.000000e+00> : vector<8xf32>
    %60 = vector.multi_reduction <add>, %59, %cst_32 [1] : vector<8x32xf32> to vector<8xf32>
    %61 = vector.shape_cast %60 : vector<8xf32> to vector<8x1xf32>
    %cst_33 = arith.constant 3.200000e+01 : f32
    %62 = vector.broadcast %cst_33 : f32 to vector<8x1xf32>
    %63 = arith.divf %61, %62 : vector<8x1xf32>
    %64 = vector.broadcast %56 : vector<8x1xf32> to vector<8x32xf32>
    %65 = arith.subf %52, %64 : vector<8x32xf32>
    %cst_34 = arith.constant 9.99999974E-6 : f32
    %66 = vector.broadcast %cst_34 : f32 to vector<8x1xf32>
    %67 = arith.addf %63, %66 : vector<8x1xf32>
    %68 = math.rsqrt %67 : vector<8x1xf32>
    %69 = vector.broadcast %68 : vector<8x1xf32> to vector<8x32xf32>
    %70 = arith.mulf %65, %69 : vector<8x32xf32>
    %c0_35 = arith.constant 0 : index
    %c0_36 = arith.constant 0 : index
    %71 = vector.load %arg12[%c0_35, %c0_36] : memref<1x32xf32, #tpu.memory_space<vmem>>, vector<1x32xf32>
    %72 = vector.broadcast %71 : vector<1x32xf32> to vector<8x32xf32>
    %73 = arith.mulf %70, %72 : vector<8x32xf32>
    %c0_37 = arith.constant 0 : index
    %c0_38 = arith.constant 0 : index
    %74 = vector.load %arg13[%c0_37, %c0_38] : memref<1x32xf32, #tpu.memory_space<vmem>>, vector<1x32xf32>
    %75 = vector.broadcast %74 : vector<1x32xf32> to vector<8x32xf32>
    %76 = arith.addf %73, %75 : vector<8x32xf32>
    %77 = arith.truncf %76 : vector<8x32xf32> to vector<8x32xbf16>
    %c0_39 = arith.constant 0 : index
    %c0_40 = arith.constant 0 : index
    %78 = vector.load %arg14[%c0_39, %c0_40] : memref<32x32xbf16, #tpu.memory_space<vmem>>, vector<32x32xbf16>
    %cst_41 = arith.constant dense<0.000000e+00> : vector<8x32xf32>
    %79 = tpu.matmul %77, %78, %cst_41 {dimension_numbers = #tpu.dot_dimension_numbers<[1], [0], [0], [1], [0, 0, 1, 1], [], []>} : vector<8x32xbf16>, vector<32x32xbf16>, vector<8x32xf32> -> vector<8x32xf32>
    %c0_42 = arith.constant 0 : index
    %c0_43 = arith.constant 0 : index
    %80 = vector.load %arg15[%c0_42, %c0_43] : memref<1x32xf32, #tpu.memory_space<vmem>>, vector<1x32xf32>
    %81 = vector.broadcast %80 : vector<1x32xf32> to vector<8x32xf32>
    %82 = arith.addf %79, %81 : vector<8x32xf32>
    %83 = arith.addf %76, %82 : vector<8x32xf32>
    %cst_44 = arith.constant dense<0.000000e+00> : vector<8xf32>
    %84 = vector.multi_reduction <add>, %83, %cst_44 [1] : vector<8x32xf32> to vector<8xf32>
    %85 = vector.shape_cast %84 : vector<8xf32> to vector<8x1xf32>
    %cst_45 = arith.constant 3.200000e+01 : f32
    %86 = vector.broadcast %cst_45 : f32 to vector<8x1xf32>
    %87 = arith.divf %85, %86 : vector<8x1xf32>
    %88 = vector.broadcast %87 : vector<8x1xf32> to vector<8x32xf32>
    %89 = arith.subf %83, %88 : vector<8x32xf32>
    %90 = arith.mulf %89, %89 : vector<8x32xf32>
    %cst_46 = arith.constant dense<0.000000e+00> : vector<8xf32>
    %91 = vector.multi_reduction <add>, %90, %cst_46 [1] : vector<8x32xf32> to vector<8xf32>
    %92 = vector.shape_cast %91 : vector<8xf32> to vector<8x1xf32>
    %cst_47 = arith.constant 3.200000e+01 : f32
    %93 = vector.broadcast %cst_47 : f32 to vector<8x1xf32>
    %94 = arith.divf %92, %93 : vector<8x1xf32>
    %95 = vector.broadcast %87 : vector<8x1xf32> to vector<8x32xf32>
    %96 = arith.subf %83, %95 : vector<8x32xf32>
    %cst_48 = arith.constant 9.99999974E-6 : f32
    %97 = vector.broadcast %cst_48 : f32 to vector<8x1xf32>
    %98 = arith.addf %94, %97 : vector<8x1xf32>
    %99 = math.rsqrt %98 : vector<8x1xf32>
    %100 = vector.broadcast %99 : vector<8x1xf32> to vector<8x32xf32>
    %101 = arith.mulf %96, %100 : vector<8x32xf32>
    %c0_49 = arith.constant 0 : index
    %c0_50 = arith.constant 0 : index
    %102 = vector.load %arg16[%c0_49, %c0_50] : memref<1x32xf32, #tpu.memory_space<vmem>>, vector<1x32xf32>
    %103 = vector.broadcast %102 : vector<1x32xf32> to vector<8x32xf32>
    %104 = arith.mulf %101, %103 : vector<8x32xf32>
    %c0_51 = arith.constant 0 : index
    %c0_52 = arith.constant 0 : index
    %105 = vector.load %arg17[%c0_51, %c0_52] : memref<1x32xf32, #tpu.memory_space<vmem>>, vector<1x32xf32>
    %106 = vector.broadcast %105 : vector<1x32xf32> to vector<8x32xf32>
    %107 = arith.addf %104, %106 : vector<8x32xf32>
    %108 = arith.truncf %107 : vector<8x32xf32> to vector<8x32xbf16>
    %c0_53 = arith.constant 0 : index
    %c0_54 = arith.constant 0 : index
    %109 = vector.load %arg18[%c0_53, %c0_54] : memref<32x2048xbf16, #tpu.memory_space<vmem>>, vector<32x2048xbf16>
    %cst_55 = arith.constant dense<0.000000e+00> : vector<8x2048xf32>
    %110 = tpu.matmul %108, %109, %cst_55 {dimension_numbers = #tpu.dot_dimension_numbers<[1], [0], [0], [1], [0, 0, 1, 1], [], []>} : vector<8x32xbf16>, vector<32x2048xbf16>, vector<8x2048xf32> -> vector<8x2048xf32>
    %c0_56 = arith.constant 0 : index
    %c0_57 = arith.constant 0 : index
    %111 = vector.load %arg19[%c0_56, %c0_57] : memref<1x2048xf32, #tpu.memory_space<vmem>>, vector<1x2048xf32>
    %112 = vector.broadcast %111 : vector<1x2048xf32> to vector<8x2048xf32>
    %113 = arith.addf %110, %112 : vector<8x2048xf32>
    %cst_58 = arith.constant 0.000000e+00 : f32
    %114 = vector.broadcast %cst_58 : f32 to vector<8x2048xf32>
    %115 = arith.maximumf %113, %114 : vector<8x2048xf32>
    %116 = arith.truncf %115 : vector<8x2048xf32> to vector<8x2048xbf16>
    %c0_59 = arith.constant 0 : index
    %c0_60 = arith.constant 0 : index
    %117 = vector.load %arg20[%c0_59, %c0_60] : memref<2048x32xbf16, #tpu.memory_space<vmem>>, vector<2048x32xbf16>
    %cst_61 = arith.constant dense<0.000000e+00> : vector<8x32xf32>
    %118 = tpu.matmul %116, %117, %cst_61 {dimension_numbers = #tpu.dot_dimension_numbers<[1], [0], [0], [1], [0, 0, 1, 1], [], []>} : vector<8x2048xbf16>, vector<2048x32xbf16>, vector<8x32xf32> -> vector<8x32xf32>
    %c0_62 = arith.constant 0 : index
    %c0_63 = arith.constant 0 : index
    %119 = vector.load %arg21[%c0_62, %c0_63] : memref<1x32xf32, #tpu.memory_space<vmem>>, vector<1x32xf32>
    %120 = vector.broadcast %119 : vector<1x32xf32> to vector<8x32xf32>
    %121 = arith.addf %118, %120 : vector<8x32xf32>
    %122 = arith.addf %107, %121 : vector<8x32xf32>
    %cst_64 = arith.constant dense<0.000000e+00> : vector<8xf32>
    %123 = vector.multi_reduction <add>, %122, %cst_64 [1] : vector<8x32xf32> to vector<8xf32>
    %124 = vector.shape_cast %123 : vector<8xf32> to vector<8x1xf32>
    %cst_65 = arith.constant 3.200000e+01 : f32
    %125 = vector.broadcast %cst_65 : f32 to vector<8x1xf32>
    %126 = arith.divf %124, %125 : vector<8x1xf32>
    %127 = vector.broadcast %126 : vector<8x1xf32> to vector<8x32xf32>
    %128 = arith.subf %122, %127 : vector<8x32xf32>
    %129 = arith.mulf %128, %128 : vector<8x32xf32>
    %cst_66 = arith.constant dense<0.000000e+00> : vector<8xf32>
    %130 = vector.multi_reduction <add>, %129, %cst_66 [1] : vector<8x32xf32> to vector<8xf32>
    %131 = vector.shape_cast %130 : vector<8xf32> to vector<8x1xf32>
    %cst_67 = arith.constant 3.200000e+01 : f32
    %132 = vector.broadcast %cst_67 : f32 to vector<8x1xf32>
    %133 = arith.divf %131, %132 : vector<8x1xf32>
    %134 = vector.broadcast %126 : vector<8x1xf32> to vector<8x32xf32>
    %135 = arith.subf %122, %134 : vector<8x32xf32>
    %cst_68 = arith.constant 9.99999974E-6 : f32
    %136 = vector.broadcast %cst_68 : f32 to vector<8x1xf32>
    %137 = arith.addf %133, %136 : vector<8x1xf32>
    %138 = math.rsqrt %137 : vector<8x1xf32>
    %139 = vector.broadcast %138 : vector<8x1xf32> to vector<8x32xf32>
    %140 = arith.mulf %135, %139 : vector<8x32xf32>
    %c0_69 = arith.constant 0 : index
    %c0_70 = arith.constant 0 : index
    %141 = vector.load %arg22[%c0_69, %c0_70] : memref<1x32xf32, #tpu.memory_space<vmem>>, vector<1x32xf32>
    %142 = vector.broadcast %141 : vector<1x32xf32> to vector<8x32xf32>
    %143 = arith.mulf %140, %142 : vector<8x32xf32>
    %c0_71 = arith.constant 0 : index
    %c0_72 = arith.constant 0 : index
    %144 = vector.load %arg23[%c0_71, %c0_72] : memref<1x32xf32, #tpu.memory_space<vmem>>, vector<1x32xf32>
    %145 = vector.broadcast %144 : vector<1x32xf32> to vector<8x32xf32>
    %146 = arith.addf %143, %145 : vector<8x32xf32>
    %147 = arith.truncf %146 : vector<8x32xf32> to vector<8x32xbf16>
    %c0_73 = arith.constant 0 : index
    %c0_74 = arith.constant 0 : index
    %148 = vector.load %arg24[%c0_73, %c0_74] : memref<32x256xbf16, #tpu.memory_space<vmem>>, vector<32x256xbf16>
    %cst_75 = arith.constant dense<0.000000e+00> : vector<8x256xf32>
    %149 = tpu.matmul %147, %148, %cst_75 {dimension_numbers = #tpu.dot_dimension_numbers<[1], [0], [0], [1], [0, 0, 1, 1], [], []>} : vector<8x32xbf16>, vector<32x256xbf16>, vector<8x256xf32> -> vector<8x256xf32>
    %c0_76 = arith.constant 0 : index
    %c0_77 = arith.constant 0 : index
    %150 = vector.load %arg25[%c0_76, %c0_77] : memref<1x256xf32, #tpu.memory_space<vmem>>, vector<1x256xf32>
    %151 = vector.broadcast %150 : vector<1x256xf32> to vector<8x256xf32>
    %152 = arith.addf %149, %151 : vector<8x256xf32>
    %cst_78 = arith.constant 0.000000e+00 : f32
    %153 = vector.broadcast %cst_78 : f32 to vector<8x256xf32>
    %154 = arith.maximumf %152, %153 : vector<8x256xf32>
    %155 = arith.truncf %154 : vector<8x256xf32> to vector<8x256xbf16>
    %c0_79 = arith.constant 0 : index
    %c0_80 = arith.constant 0 : index
    %156 = vector.load %arg26[%c0_79, %c0_80] : memref<256x128xbf16, #tpu.memory_space<vmem>>, vector<256x128xbf16>
    %cst_81 = arith.constant dense<0.000000e+00> : vector<8x128xf32>
    %157 = tpu.matmul %155, %156, %cst_81 {dimension_numbers = #tpu.dot_dimension_numbers<[1], [0], [0], [1], [0, 0, 1, 1], [], []>} : vector<8x256xbf16>, vector<256x128xbf16>, vector<8x128xf32> -> vector<8x128xf32>
    %c0_82 = arith.constant 0 : index
    %c0_83 = arith.constant 0 : index
    %158 = vector.load %arg27[%c0_82, %c0_83] : memref<1x128xf32, #tpu.memory_space<vmem>>, vector<1x128xf32>
    %159 = vector.broadcast %158 : vector<1x128xf32> to vector<8x128xf32>
    %160 = arith.addf %157, %159 : vector<8x128xf32>
    %cst_84 = arith.constant 0.000000e+00 : f32
    %161 = vector.broadcast %cst_84 : f32 to vector<8x128xf32>
    %162 = arith.maximumf %160, %161 : vector<8x128xf32>
    %163 = arith.truncf %162 : vector<8x128xf32> to vector<8x128xbf16>
    %c0_85 = arith.constant 0 : index
    %c0_86 = arith.constant 0 : index
    %164 = vector.load %arg28[%c0_85, %c0_86] : memref<128x128xbf16, #tpu.memory_space<vmem>>, vector<128x128xbf16>
    %cst_87 = arith.constant dense<0.000000e+00> : vector<8x128xf32>
    %165 = tpu.matmul %163, %164, %cst_87 {dimension_numbers = #tpu.dot_dimension_numbers<[1], [0], [0], [1], [0, 0, 1, 1], [], []>} : vector<8x128xbf16>, vector<128x128xbf16>, vector<8x128xf32> -> vector<8x128xf32>
    %c0_88 = arith.constant 0 : index
    %c0_89 = arith.constant 0 : index
    %166 = vector.load %arg29[%c0_88, %c0_89] : memref<1x128xf32, #tpu.memory_space<vmem>>, vector<1x128xf32>
    %167 = vector.broadcast %166 : vector<1x128xf32> to vector<8x128xf32>
    %168 = arith.addf %165, %167 : vector<8x128xf32>
    %c0_90 = arith.constant 0 : index
    %c0_91 = arith.constant 0 : index
    %169 = vector.load %arg30[%c0_90, %c0_91] : memref<8x128xf32, #tpu.memory_space<vmem>>, vector<8x128xf32>
    tpu.vector_store %arg30[%c0_90, %c0_91], %168 {strides = array<i32>} : memref<8x128xf32, #tpu.memory_space<vmem>>, vector<8x128xf32>,
    return
  }
  func.func @transform_0(%arg0: i32) -> (i32, i32) {
    %c0_i32 = arith.constant 0 : i32
    %c0_i32_0 = arith.constant 0 : i32
    return %arg0, %c0_i32 : i32, i32
  }
  func.func @transform_1(%arg0: i32) -> (i32, i32) {
    %c0_i32 = arith.constant 0 : i32
    %c0_i32_0 = arith.constant 0 : i32
    %c0_i32_1 = arith.constant 0 : i32
    return %c0_i32, %c0_i32_0 : i32, i32
  }
  func.func @transform_2(%arg0: i32) -> (i32, i32) {
    %c0_i32 = arith.constant 0 : i32
    %c0_i32_0 = arith.constant 0 : i32
    %c0_i32_1 = arith.constant 0 : i32
    return %c0_i32, %c0_i32_0 : i32, i32
  }
  func.func @transform_3(%arg0: i32) -> (i32, i32) {
    %c0_i32 = arith.constant 0 : i32
    %c0_i32_0 = arith.constant 0 : i32
    %c0_i32_1 = arith.constant 0 : i32
    return %c0_i32, %c0_i32_0 : i32, i32
  }
  func.func @transform_4(%arg0: i32) -> (i32, i32) {
    %c0_i32 = arith.constant 0 : i32
    %c0_i32_0 = arith.constant 0 : i32
    %c0_i32_1 = arith.constant 0 : i32
    return %c0_i32, %c0_i32_0 : i32, i32
  }
  func.func @transform_5(%arg0: i32) -> (i32, i32) {
    %c0_i32 = arith.constant 0 : i32
    %c0_i32_0 = arith.constant 0 : i32
    %c0_i32_1 = arith.constant 0 : i32
    return %c0_i32, %c0_i32_0 : i32, i32
  }
  func.func @transform_6(%arg0: i32) -> (i32, i32) {
    %c0_i32 = arith.constant 0 : i32
    %c0_i32_0 = arith.constant 0 : i32
    %c0_i32_1 = arith.constant 0 : i32
    return %c0_i32, %c0_i32_0 : i32, i32
  }
  func.func @transform_7(%arg0: i32) -> (i32, i32) {
    %c0_i32 = arith.constant 0 : i32
    %c0_i32_0 = arith.constant 0 : i32
    %c0_i32_1 = arith.constant 0 : i32
    return %c0_i32, %c0_i32_0 : i32, i32
  }
  func.func @transform_8(%arg0: i32) -> (i32, i32) {
    %c0_i32 = arith.constant 0 : i32
    %c0_i32_0 = arith.constant 0 : i32
    %c0_i32_1 = arith.constant 0 : i32
    return %c0_i32, %c0_i32_0 : i32, i32
  }
  func.func @transform_9(%arg0: i32) -> (i32, i32) {
    %c0_i32 = arith.constant 0 : i32
    %c0_i32_0 = arith.constant 0 : i32
    %c0_i32_1 = arith.constant 0 : i32
    return %c0_i32, %c0_i32_0 : i32, i32
  }
  func.func @transform_10(%arg0: i32) -> (i32, i32) {
    %c0_i32 = arith.constant 0 : i32
    %c0_i32_0 = arith.constant 0 : i32
    %c0_i32_1 = arith.constant 0 : i32
    return %c0_i32, %c0_i32_0 : i32, i32
  }
  func.func @transform_11(%arg0: i32) -> (i32, i32) {
    %c0_i32 = arith.constant 0 : i32
    %c0_i32_0 = arith.constant 0 : i32
    %c0_i32_1 = arith.constant 0 : i32
    return %c0_i32, %c0_i32_0 : i32, i32
  }
  func.func @transform_12(%arg0: i32) -> (i32, i32) {
    %c0_i32 = arith.constant 0 : i32
    %c0_i32_0 = arith.constant 0 : i32
    %c0_i32_1 = arith.constant 0 : i32
    return %c0_i32, %c0_i32_0 : i32, i32
  }
  func.func @transform_13(%arg0: i32) -> (i32, i32) {
    %c0_i32 = arith.constant 0 : i32
    %c0_i32_0 = arith.constant 0 : i32
    %c0_i32_1 = arith.constant 0 : i32
    return %c0_i32, %c0_i32_0 : i32, i32
  }
  func.func @transform_14(%arg0: i32) -> (i32, i32) {
    %c0_i32 = arith.constant 0 : i32
    %c0_i32_0 = arith.constant 0 : i32
    %c0_i32_1 = arith.constant 0 : i32
    return %c0_i32, %c0_i32_0 : i32, i32
  }
  func.func @transform_15(%arg0: i32) -> (i32, i32) {
    %c0_i32 = arith.constant 0 : i32
    %c0_i32_0 = arith.constant 0 : i32
    %c0_i32_1 = arith.constant 0 : i32
    return %c0_i32, %c0_i32_0 : i32, i32
  }
  func.func @transform_16(%arg0: i32) -> (i32, i32) {
    %c0_i32 = arith.constant 0 : i32
    %c0_i32_0 = arith.constant 0 : i32
    %c0_i32_1 = arith.constant 0 : i32
    return %c0_i32, %c0_i32_0 : i32, i32
  }
  func.func @transform_17(%arg0: i32) -> (i32, i32) {
    %c0_i32 = arith.constant 0 : i32
    %c0_i32_0 = arith.constant 0 : i32
    %c0_i32_1 = arith.constant 0 : i32
    return %c0_i32, %c0_i32_0 : i32, i32
  }
  func.func @transform_18(%arg0: i32) -> (i32, i32) {
    %c0_i32 = arith.constant 0 : i32
    %c0_i32_0 = arith.constant 0 : i32
    %c0_i32_1 = arith.constant 0 : i32
    return %c0_i32, %c0_i32_0 : i32, i32
  }
  func.func @transform_19(%arg0: i32) -> (i32, i32) {
    %c0_i32 = arith.constant 0 : i32
    %c0_i32_0 = arith.constant 0 : i32
    %c0_i32_1 = arith.constant 0 : i32
    return %c0_i32, %c0_i32_0 : i32, i32
  }
  func.func @transform_20(%arg0: i32) -> (i32, i32) {
    %c0_i32 = arith.constant 0 : i32
    %c0_i32_0 = arith.constant 0 : i32
    %c0_i32_1 = arith.constant 0 : i32
    return %c0_i32, %c0_i32_0 : i32, i32
  }
  func.func @transform_21(%arg0: i32) -> (i32, i32) {
    %c0_i32 = arith.constant 0 : i32
    %c0_i32_0 = arith.constant 0 : i32
    %c0_i32_1 = arith.constant 0 : i32
    return %c0_i32, %c0_i32_0 : i32, i32
  }
  func.func @transform_22(%arg0: i32) -> (i32, i32) {
    %c0_i32 = arith.constant 0 : i32
    %c0_i32_0 = arith.constant 0 : i32
    %c0_i32_1 = arith.constant 0 : i32
    return %c0_i32, %c0_i32_0 : i32, i32
  }
  func.func @transform_23(%arg0: i32) -> (i32, i32) {
    %c0_i32 = arith.constant 0 : i32
    %c0_i32_0 = arith.constant 0 : i32
    %c0_i32_1 = arith.constant 0 : i32
    return %c0_i32, %c0_i32_0 : i32, i32
  }
  func.func @transform_24(%arg0: i32) -> (i32, i32) {
    %c0_i32 = arith.constant 0 : i32
    %c0_i32_0 = arith.constant 0 : i32
    %c0_i32_1 = arith.constant 0 : i32
    return %c0_i32, %c0_i32_0 : i32, i32
  }
  func.func @transform_25(%arg0: i32) -> (i32, i32) {
    %c0_i32 = arith.constant 0 : i32
    %c0_i32_0 = arith.constant 0 : i32
    %c0_i32_1 = arith.constant 0 : i32
    return %c0_i32, %c0_i32_0 : i32, i32
  }
  func.func @transform_26(%arg0: i32) -> (i32, i32) {
    %c0_i32 = arith.constant 0 : i32
    %c0_i32_0 = arith.constant 0 : i32
    %c0_i32_1 = arith.constant 0 : i32
    return %c0_i32, %c0_i32_0 : i32, i32
  }
  func.func @transform_27(%arg0: i32) -> (i32, i32) {
    %c0_i32 = arith.constant 0 : i32
    %c0_i32_0 = arith.constant 0 : i32
    %c0_i32_1 = arith.constant 0 : i32
    return %c0_i32, %c0_i32_0 : i32, i32
  }
  func.func @transform_28(%arg0: i32) -> (i32, i32) {
    %c0_i32 = arith.constant 0 : i32
    %c0_i32_0 = arith.constant 0 : i32
    %c0_i32_1 = arith.constant 0 : i32
    return %c0_i32, %c0_i32_0 : i32, i32
  }
  func.func @transform_29(%arg0: i32) -> (i32, i32) {
    %c0_i32 = arith.constant 0 : i32
    %c0_i32_0 = arith.constant 0 : i32
    return %arg0, %c0_i32 : i32, i32
  }
}

</mosaic_0001>

<bundles_post_ra>
// kernel: tab_transformer_forward.1
= control target key start
LH: loop header
LB: loop body
LE: loop exit
PB: predicated region body
PF: predicated region fallthrough
CT: control target
= control target key end

     0   :  { %s5980_s3 = smov 1   ;;  %s5981_s10 = smov 3   ;;  %vm137_vm0 = vcmask 130048   ;;  %vm175_vm1 = vcmask 261120   ;;  %v5986_v16 = vmov 32.0   ;;  %s6716_s0 = inlined_call_operand.smem [shape: u32[30], index: -1, kind: input, shape index: {}] }
   0x1   :  { %s4094_s6 = sld [smem:[%s6716_s0 + %s5980_s3]]   ;;  %s5982_s14 = smov 2   ;;  %5970 = vrcp.f32 %v5986_v16 }
   0x2   :  { %s1_s9 = sld [smem:[%s6716_s0]]   ;;  %s5983_s18 = smov 4  }
   0x3   :  { %s4096_s13 = sld [smem:[%s6716_s0 + %s5981_s10]]   ;;  %s5984_s22 = smov 5  }
   0x4   :  { %s4095_s17 = sld [smem:[%s6716_s0 + %s5982_s14]]   ;;  %s5985_s26 = smov 6  }
   0x5   :  { %s4097_s21 = sld [smem:[%s6716_s0 + %s5983_s18]]   ;;  %s5987_s30 = smov 7  }
   0x6   :  { %s6034_s25 = sld [smem:[%s6716_s0 + %s5984_s22]]   ;;  %s5988_s4 = smov 9  }
   0x7   :  { %v5572_v0 = vld [vmem:[%s4094_s6] sm:$0xff]  ;;  %s6039_s29 = sld [smem:[%s6716_s0 + %s5985_s26]]   ;;  %v5971_v17 = vpop.eup %5970  ;;  %s5989_s8 = smov 8  }
   0x8   :  { %v123_v1 = vld [vmem:[%s1_s9] sm:$0xff]  ;;  %148 = vmatpush.bf16.msra.mxu0 %v5572_v0  ;;  %v197_v18 = vmul.f32 32.0, %v5971_v17  ;;  %vm201_vm2 = vweird.f32 %v5971_v17  ;;  %s6053_s3 = sld [smem:[%s6716_s0 + %s5987_s30]]   ;;  %s5990_s12 = smov 10  }
   0x9   :  { %v124_v2 = vpack.c.bf16 %v123_v1, %v123_v1  ;;  %v5574_v3 = vld [vmem:[%s4096_s13 + $0x8] sm:$0xff]  ;;  %v5573_v4 = vld [vmem:[%s4096_s13] sm:$0xff]  ;;  %s6148_s7 = sld [smem:[%s6716_s0 + %s5988_s4]]   ;;  %s5991_s16 = smov 11  }
   0xa   :  { %v5955_v5 = vld [vmem:[%s4095_s17] ss:$0 sm:$0xff]  ;;  %v198_v19 = vsub.f32 1.0, %v197_v18  ;;  %s6233_s11 = sld [smem:[%s6716_s0 + %s5989_s8]]   ;;  %s5992_s20 = smov 12  }
   0xb   :  { %4127 = vmatmul.msk.bf16.vlgmr.msra.gmra.mxu0 %vm137_vm0, %v124_v2  ;;  %v5956_v10 = vld [vmem:[%s4097_s21] ss:$0 sm:$0xff]  ;;  %s6251_s15 = sld [smem:[%s6716_s0 + %s5990_s12]]   ;;  %s5993_s24 = smov 14  }
   0xc   :  { %185 = vmatpush.bf16.msrb.mxu0 %v5574_v3  ;;  %v199_v20 = vmul.f32 %v5971_v17, %v198_v19  ;;  %s6330_s19 = sld [smem:[%s6716_s0 + %s5991_s16]]   ;;  %s5994_s28 = smov 13  }
   0xd   :  { %s6336_s23 = sld [smem:[%s6716_s0 + %s5992_s20]]   ;;  %s5995_s2 = smov 15  }
   0xe   :  { %v200_v21 = vadd.f32 %v5971_v17, %v199_v20  ;;  %v4203_v28 = vld [vmem:[%s6053_s3 + $0x80] sm:$0xf]  ;;  %v5591_v30 = vld [vmem:[%s6053_s3 + $0x84] sm:$0xf]  ;;  %v4211_v33 = vld [vmem:[%s6053_s3 + $0x88] sm:$0xf]  ;;  %s4107_s27 = sld [smem:[%s6716_s0 + %s5993_s24]]  }
   0xf   :  { %v5599_v29 = vld [vmem:[%s6053_s3 + $0xbc] sm:$0xf0]  ;;  %v4205_v32 = vld [vmem:[%s6053_s3 + $0xc0] sm:$0xf0]  ;;  %v5600_v34 = vld [vmem:[%s6053_s3 + $0xc4] sm:$0xf0]  ;;  %s4106_s1 = sld [smem:[%s6716_s0 + %s5994_s28]]  }
  0x10   :  { %186 = vmatpush.bf16.msrb.mxu0 %v5573_v4  ;;  %v6042_v22 = vsel %vm201_vm2, %v5971_v17, %v200_v21  ;;  %v4204_v31 = vor.u32 %v5599_v29, %v4203_v28  ;;  %v4208_v35 = vor.u32 %v5591_v30, %v4205_v32  ;;  %v4212_v36 = vor.u32 %v5600_v34, %v4211_v33  ;;  %v5592_v37 = vld [vmem:[%s6053_s3 + $0x8c] sm:$0xf]  ;;  %v4139_v40 = vld [vmem:[%s6053_s3] sm:$0xf]  ;;  %v5575_v42 = vld [vmem:[%s6053_s3 + $0x4] sm:$0xf]  ;;  %s6354_s5 = sld [smem:[%s6716_s0 + %s5995_s2]]  }
  0x11   :  { %v4213_v38 = vld [vmem:[%s6053_s3 + $0xc8] sm:$0xf0]  ;;  %v5583_v41 = vld [vmem:[%s6053_s3 + $0x3c] sm:$0xf0]  ;;  %v4141_v44 = vld [vmem:[%s6053_s3 + $0x40] sm:$0xf0] }
  0x12   :  { %470 = vmatpush.bf16.msra.mxu2 %v4204_v31  ;;  %v4216_v39 = vor.u32 %v5592_v37, %v4213_v38  ;;  %483 = vmatpush.bf16.msra.mxu3 %v4208_v35  ;;  %v4140_v43 = vor.u32 %v5583_v41, %v4139_v40  ;;  %v4147_v45 = vld [vmem:[%s6053_s3 + $0x8] sm:$0xf]  ;;  %v4144_v47 = vor.u32 %v5575_v42, %v4141_v44  ;;  %v5576_v49 = vld [vmem:[%s6053_s3 + $0xc] sm:$0xf]  ;;  %v4219_v53 = vld [vmem:[%s6053_s3 + $0x90] sm:$0xf] }
  0x13   :  { %v5584_v46 = vld [vmem:[%s6053_s3 + $0x44] sm:$0xf0]  ;;  %v4149_v50 = vld [vmem:[%s6053_s3 + $0x48] sm:$0xf0]  ;;  %v5601_v54 = vld [vmem:[%s6053_s3 + $0xcc] sm:$0xf0] }
  0x14   :  { %496 = vmatpush.bf16.msra.mxu0 %v4212_v36  ;;  %509 = vmatpush.bf16.msra.mxu1 %v4216_v39  ;;  %v4148_v48 = vor.u32 %v5584_v46, %v4147_v45  ;;  %v4152_v51 = vor.u32 %v5576_v49, %v4149_v50  ;;  %v5593_v55 = vld [vmem:[%s6053_s3 + $0x94] sm:$0xf]  ;;  %v4220_v57 = vor.u32 %v5601_v54, %v4219_v53  ;;  %v4227_v59 = vld [vmem:[%s6053_s3 + $0x98] sm:$0xf]  ;;  %v5594_v63 = vld [vmem:[%s6053_s3 + $0x9c] sm:$0xf] }
  0x15   :  { %v4221_v58 = vld [vmem:[%s6053_s3 + $0xd0] sm:$0xf0]  ;;  %v5602_v60 = vld [vmem:[%s6053_s3 + $0xd4] sm:$0xf0]  ;;  %v4229_v0 = vld [vmem:[%s6053_s3 + $0xd8] sm:$0xf0] }
  0x16   :  { %471 = vmatpush.bf16.msra.mxu2 %v4140_v43  ;;  %484 = vmatpush.bf16.msra.mxu3 %v4144_v47  ;;  %v4224_v61 = vor.u32 %v5593_v55, %v4221_v58  ;;  %v4228_v62 = vor.u32 %v5602_v60, %v4227_v59  ;;  %v4155_v1 = vld [vmem:[%s6053_s3 + $0x10] sm:$0xf]  ;;  %v4232_v3 = vor.u32 %v5594_v63, %v4229_v0  ;;  %v5957_v21 = vld [vmem:[%s6034_s25] ss:$0 sm:$0xff]  ;;  %v5595_v30 = vld [vmem:[%s6053_s3 + $0xa4] sm:$0xf] }
  0x17   :  { %v5585_v4 = vld [vmem:[%s6053_s3 + $0x4c] sm:$0xf0]  ;;  %v4235_v28 = vld [vmem:[%s6053_s3 + $0xa0] sm:$0xf]  ;;  %v4237_v31 = vld [vmem:[%s6053_s3 + $0xe0] sm:$0xf0] }
  0x18   :  { %497 = vmatpush.bf16.msra.mxu0 %v4148_v48  ;;  %510 = vmatpush.bf16.msra.mxu1 %v4152_v51  ;;  %v5603_v29 = vld [vmem:[%s6053_s3 + $0xdc] sm:$0xf0]  ;;  %v4243_v32 = vld [vmem:[%s6053_s3 + $0xa8] sm:$0xf]  ;;  %v5596_v35 = vld [vmem:[%s6053_s3 + $0xac] sm:$0xf]  ;;  %v4240_v38 = vor.u32 %v5595_v30, %v4237_v31 }
  0x19   :  { %v5604_v34 = vld [vmem:[%s6053_s3 + $0xe4] sm:$0xf0]  ;;  %v4245_v36 = vld [vmem:[%s6053_s3 + $0xe8] sm:$0xf0]  ;;  %v4236_v37 = vor.u32 %v5603_v29, %v4235_v28  ;;  %v4171_v39 = vld [vmem:[%s6053_s3 + $0x20] sm:$0xf] }
  0x1a   :  { %522 = vmatpush.bf16.msrb.mxu2 %v4220_v57  ;;  %535 = vmatpush.bf16.msrb.mxu3 %v4224_v61  ;;  %v5587_v40 = vld [vmem:[%s6053_s3 + $0x5c] sm:$0xf0]  ;;  %v4244_v41 = vor.u32 %v5604_v34, %v4243_v32  ;;  %v4248_v42 = vor.u32 %v5596_v35, %v4245_v36  ;;  %v5579_v43 = vld [vmem:[%s6053_s3 + $0x24] sm:$0xf]  ;;  %v4179_v45 = vld [vmem:[%s6053_s3 + $0x28] sm:$0xf] }
  0x1b   :  { %v4173_v44 = vld [vmem:[%s6053_s3 + $0x60] sm:$0xf0]  ;;  %v5588_v46 = vld [vmem:[%s6053_s3 + $0x64] sm:$0xf0]  ;;  %v5580_v47 = vld [vmem:[%s6053_s3 + $0x2c] sm:$0xf]  ;;  %v4172_v49 = vor.u32 %v5587_v40, %v4171_v39 }
  0x1c   :  { %561 = vmatpush.bf16.msrb.mxu1 %v4232_v3  ;;  %v4181_v48 = vld [vmem:[%s6053_s3 + $0x68] sm:$0xf0]  ;;  %v4176_v50 = vor.u32 %v5579_v43, %v4173_v44  ;;  %v4180_v51 = vor.u32 %v5588_v46, %v4179_v45  ;;  %v4251_v53 = vld [vmem:[%s6053_s3 + $0xb0] sm:$0xf]  ;;  %v5597_v55 = vld [vmem:[%s6053_s3 + $0xb4] sm:$0xf] }
  0x1d   :  { %v5605_v54 = vld [vmem:[%s6053_s3 + $0xec] sm:$0xf0]  ;;  %v4259_v57 = vld [vmem:[%s6053_s3 + $0xb8] sm:$0xf]  ;;  %v5598_v59 = vld [vmem:[%s6053_s3 + $0xbc] sm:$0xf] }
  0x1e   :  { %v5606_v58 = vld [vmem:[%s6053_s3 + $0xf4] sm:$0xf0]  ;;  %v4261_v60 = vld [vmem:[%s6053_s3 + $0xf8] sm:$0xf0]  ;;  %v4252_v61 = vor.u32 %v5605_v54, %v4251_v53  ;;  %v4187_v63 = vld [vmem:[%s6053_s3 + $0x30] sm:$0xf] }
  0x1f   :  { %v5589_v0 = vld [vmem:[%s6053_s3 + $0x6c] sm:$0xf0]  ;;  %v5581_v3 = vld [vmem:[%s6053_s3 + $0x34] sm:$0xf]  ;;  %v5635_v28 = vld [vmem:[%s6148_s7 + $0xe0] sm:$0xff]  ;;  %s5996_s6 = smov 16  }
  0x20   :  { %v5611_v29 = vld [vmem:[%s6148_s7 + $0x20] sm:$0xff]  ;;  %v5626_v31 = vld [vmem:[%s6148_s7 + $0x98] sm:$0xff]  ;;  %v5625_v36 = vld [vmem:[%s6148_s7 + $0x90] sm:$0xff]  ;;  %s6359_s9 = sld [smem:[%s6716_s0 + %s5996_s6]]   ;;  %s5997_s10 = smov 17  }
  0x21   :  { %v5619_v30 = vld [vmem:[%s6148_s7 + $0x60] sm:$0xff]  ;;  %v5634_v32 = vld [vmem:[%s6148_s7 + $0xd8] sm:$0xff]  ;;  %v5617_v39 = vld [vmem:[%s6148_s7 + $0x50] sm:$0xff]  ;;  %s6371_s13 = sld [smem:[%s6716_s0 + %s5997_s10]]   ;;  %s5998_s14 = smov 19  }
  0x22   :  { %v5610_v34 = vld [vmem:[%s6148_s7 + $0x18] sm:$0xff]  ;;  %v5624_v40 = vld [vmem:[%s6148_s7 + $0x88] sm:$0xff]  ;;  %v5623_v43 = vld [vmem:[%s6148_s7 + $0x80] sm:$0xff]  ;;  %s6466_s17 = sld [smem:[%s6716_s0 + %s5998_s14]]   ;;  %s5999_s18 = smov 18  }
  0x23   :  { %v5618_v35 = vld [vmem:[%s6148_s7 + $0x58] sm:$0xff]  ;;  %v5631_v44 = vld [vmem:[%s6148_s7 + $0xc0] sm:$0xff]  ;;  %v5645_v53 = vld [vmem:[%s6148_s7 + $0x130] sm:$0xff]  ;;  %s6551_s21 = sld [smem:[%s6716_s0 + %s5999_s18]]   ;;  %s6000_s22 = smov 20  }
  0x24   :  { %v5662_v45 = vld [vmem:[%s6148_s7 + $0x1b8] sm:$0xff]  ;;  %v5653_v54 = vld [vmem:[%s6148_s7 + $0x170] sm:$0xff]  ;;  %s6569_s25 = sld [smem:[%s6716_s0 + %s6000_s22]]   ;;  %s6001_s26 = smov 21  }
  0x25   :  { %v5670_v46 = vld [vmem:[%s6148_s7 + $0x1f8] sm:$0xff]  ;;  %s6002_s30 = smov 22   ;;  %s6003_s4 = smov 23  }
  0x26   :  { %s6004_s8 = smov 25   ;;  %s6005_s12 = smov 26  }
  0x27   :  { %s6006_s16 = smov 27   ;;  %s6007_s20 = smov 24  }
  0x28   :  { %s6008_s24 = smov 28   ;;  %s6009_s28 = smov 29  }
  0x88   :  { %v150_v6 = vpop.f32.mrf.mxu0 }
  0x89   :  { %v151_v7 = vadd.f32 %v5955_v5, %v150_v6  ;;  %v5577_v5 = vld [vmem:[%s6053_s3 + $0x14] sm:$0xf]  ;;  %v4156_v6 = vor.u32 %v5585_v4, %v4155_v1  ;;  %v4260_v1 = vor.u32 %v5606_v58, %v4259_v57  ;;  %v5644_v57 = vld [vmem:[%s6148_s7 + $0x128] sm:$0xff] }
  0x8a   :  { %v4189_v4 = vld [vmem:[%s6053_s3 + $0x70] sm:$0xf0]  ;;  %v5652_v58 = vld [vmem:[%s6148_s7 + $0x168] sm:$0xff] }
  0x8b   :  { %v154_v8 = vpack.c.bf16 %v151_v7, %v151_v7  ;;  %523 = vmatpush.bf16.msrb.mxu2 %v4156_v6  ;;  %v5590_v6 = vld [vmem:[%s6053_s3 + $0x74] sm:$0xf0] }
  0x8d   :  { %4136 = vmatmul.msk.bf16.vlgmr.msrb.gmra.mxu0 %vm175_vm1, %v154_v8  ;;  %v4163_v8 = vld [vmem:[%s6053_s3 + $0x18] sm:$0xf] }
  0x8e   :  { %548 = vmatpush.bf16.msrb.mxu0 %v4228_v62 }
  0x90   :  { %v152_v9 = vpop.f32.mrf.mxu0 }
  0x91   :  { %v5586_v9 = vld [vmem:[%s6053_s3 + $0x54] sm:$0xf0] }
 0x10a   :  { %v188_v11 = vpop.f32.mrf.mxu0 }
 0x10b   :  { %v189_v12 = vadd.f32 %v5956_v10, %v188_v11  ;;  %v4164_v11 = vor.u32 %v5586_v9, %v4163_v8  ;;  %v4197_v8 = vld [vmem:[%s6053_s3 + $0x78] sm:$0xf0]  ;;  %v4188_v9 = vor.u32 %v5589_v0, %v4187_v63 }
 0x10c   :  { %v5658_v63 = vld [vmem:[%s6148_s7 + $0x198] sm:$0xff] }
 0x10d   :  { %v192_v13 = vadd.f32 %v189_v12, %v151_v7  ;;  %v4157_v7 = vld [vmem:[%s6053_s3 + $0x50] sm:$0xf0]  ;;  %v5578_v12 = vld [vmem:[%s6053_s3 + $0x1c] sm:$0xf]  ;;  %549 = vmatpush.bf16.msrb.mxu0 %v4164_v11 }
 0x10e   :  { %v4160_v10 = vor.u32 %v5577_v5, %v4157_v7  ;;  %v4195_v5 = vld [vmem:[%s6053_s3 + $0x38] sm:$0xf]  ;;  %v5582_v7 = vld [vmem:[%s6053_s3 + $0x3c] sm:$0xf] }
 0x10f   :  { %v193_v14 = vsel %vm175_vm1, %v192_v13, 0.0  ;;  %v4196_v11 = vor.u32 %v5590_v6, %v4195_v5  ;;  %v5666_v0 = vld [vmem:[%s6148_s7 + $0x1d8] sm:$0xff]  ;;  %v5656_v5 = vld [vmem:[%s6148_s7 + $0x188] sm:$0xff] }
 0x110   :  { %194 = vadd.xlane.f32.xlu0 %v193_v14  ;;  %536 = vmatpush.bf16.msrb.mxu3 %v4160_v10  ;;  %v4192_v10 = vor.u32 %v5581_v3, %v4189_v4  ;;  %v5642_v3 = vld [vmem:[%s6148_s7 + $0x118] sm:$0xff]  ;;  %v5664_v6 = vld [vmem:[%s6148_s7 + $0x1c8] sm:$0xff] }
 0x111   :  { %v5650_v4 = vld [vmem:[%s6148_s7 + $0x158] sm:$0xff] }
 0x112   :  { %v190_v15 = vpop.f32.mrf.mxu0 }
 0x183   :  { %v195_v23 = vpop.xlane.xlu0 %194 }
 0x184   :  { %v203_v24 = vmul.f32 %v6042_v22, %v195_v23 }
 0x186   :  { %v6045_v25 = vsub.f32 %v192_v13, %v203_v24  ;;  %v4165_v13 = vld [vmem:[%s6053_s3 + $0x58] sm:$0xf0]  ;;  %v5958_v24 = vld [vmem:[%s6039_s29] ss:$0 sm:$0xff]  ;;  %s6648_s29 = sld [smem:[%s6716_s0 + %s6001_s26]]  }
 0x187   :  { %v4168_v14 = vor.u32 %v5578_v12, %v4165_v13  ;;  %v4200_v12 = vor.u32 %v5582_v7, %v4197_v8  ;;  %v5630_v13 = vld [vmem:[%s6148_s7 + $0xb8] sm:$0xff]  ;;  %v5641_v7 = vld [vmem:[%s6148_s7 + $0x110] sm:$0xff] }
 0x188   :  { %v205_v26 = vmul.f32 %v6045_v25, %v6045_v25  ;;  %v5649_v8 = vld [vmem:[%s6148_s7 + $0x150] sm:$0xff] }
 0x189   :  { %562 = vmatpush.bf16.msrb.mxu1 %v4168_v14  ;;  %v5638_v14 = vld [vmem:[%s6148_s7 + $0xf8] sm:$0xff] }
 0x18a   :  { %v206_v27 = vsel %vm175_vm1, %v205_v26, 0.0 }
 0x18b   :  { %207 = vadd.xlane.f32.xlu0 %v206_v27 }
 0x1fe   :  { %v208_v52 = vpop.xlane.xlu0 %207 }
 0x1ff   :  { %v209_v56 = vmul.f32 %v208_v52, %v6042_v22  ;;  %v4184_v52 = vor.u32 %v5580_v47, %v4181_v48  ;;  %v5607_v47 = vld [vmem:[%s6148_s7] sm:$0xff] }
 0x200   :  { %v5615_v48 = vld [vmem:[%s6148_s7 + $0x40] sm:$0xff] }
 0x201   :  { %v210_v2 = vadd.f32 1e-05, %v209_v56  ;;  %v4253_v56 = vld [vmem:[%s6053_s3 + $0xf0] sm:$0xf0]  ;;  %s6654_s3 = sld [smem:[%s6716_s0 + %s6002_s30]]  }
 0x202   :  { %v4256_v62 = vor.u32 %v5597_v55, %v4253_v56  ;;  %v5660_v55 = vld [vmem:[%s6148_s7 + $0x1a8] sm:$0xff] }
 0x203   :  { %5972 = vrsqrt.f32 %v210_v2  ;;  %vm217_vm4 = vweird.f32 %v210_v2  ;;  %v5668_v56 = vld [vmem:[%s6148_s7 + $0x1e8] sm:$0xff] }
 0x209   :  { %v5973_v15 = vpop.eup %5972 }
 0x20a   :  { %v212_v16 = vmul.f32 %v5973_v15, %v210_v2  ;;  %vm218_vm3 = vweird.f32 %v5973_v15  ;;  %v4264_v2 = vor.u32 %v5598_v59, %v4261_v60  ;;  %v5659_v59 = vld [vmem:[%s6148_s7 + $0x1a0] sm:$0xff] }
 0x20b   :  { %vm219_vm5 = vmor %vm217_vm4, %vm218_vm3  ;;  %v5667_v60 = vld [vmem:[%s6148_s7 + $0x1e0] sm:$0xff] }
 0x20c   :  { %v213_v17 = vmul.f32 %v5973_v15, %v212_v16  ;;  %v5622_v16 = vld [vmem:[%s6148_s7 + $0x78] sm:$0xff] }
 0x20e   :  { %v214_v18 = vmul.f32 0.5, %v213_v17  ;;  %v5629_v17 = vld [vmem:[%s6148_s7 + $0xb0] sm:$0xff] }
 0x210   :  { %v215_v19 = vsub.f32 1.5, %v214_v18  ;;  %v5637_v18 = vld [vmem:[%s6148_s7 + $0xf0] sm:$0xff] }
 0x212   :  { %v216_v20 = vmul.f32 %v5973_v15, %v215_v19  ;;  %v5613_v19 = vld [vmem:[%s6148_s7 + $0x30] sm:$0xff] }
 0x214   :  { %v220_v23 = vsel %vm219_vm5, %v5973_v15, %v216_v20  ;;  %v5614_v15 = vld [vmem:[%s6148_s7 + $0x38] sm:$0xff]  ;;  %v5621_v20 = vld [vmem:[%s6148_s7 + $0x70] sm:$0xff] }
 0x215   :  { %v221_v26 = vmul.f32 %v220_v23, %v6045_v25  ;;  %v5636_v23 = vld [vmem:[%s6148_s7 + $0xe8] sm:$0xff] }
 0x217   :  { %v226_v27 = vmul.f32 %v5957_v21, %v221_v26  ;;  %v5628_v21 = vld [vmem:[%s6148_s7 + $0xa8] sm:$0xff] }
 0x218   :  { %v5620_v26 = vld [vmem:[%s6148_s7 + $0x68] sm:$0xff] }
 0x219   :  { %v6096_v33 = vadd.f32 %v5958_v24, %v226_v27  ;;  %v5612_v24 = vld [vmem:[%s6148_s7 + $0x28] sm:$0xff]  ;;  %v5627_v27 = vld [vmem:[%s6148_s7 + $0xa0] sm:$0xff] }
 0x21b   :  { %v6103_v25 = vpack.c.bf16 %v6096_v33, %v6096_v33 }
 0x21d   :  { %4265 = vmatmul.msk.bf16.vlgmr.msra.gmra.mxu2 %vm175_vm1, %v6103_v25  ;;  %4266 = vmatmul.msk.bf16.vlgmr.msra.gmra.mxu3 %vm175_vm1, %v6103_v25 }
 0x21e   :  { %4267 = vmatmul.msk.bf16.vlgmr.msra.gmra.mxu0 %vm175_vm1, %v6103_v25  ;;  %4268 = vmatmul.msk.bf16.vlgmr.msra.gmra.mxu1 %vm175_vm1, %v6103_v25 }
 0x21f   :  { %574 = vmatpush.bf16.msra.mxu2 %v4236_v37  ;;  %587 = vmatpush.bf16.msra.mxu3 %v4240_v38  ;;  %v5633_v37 = vld [vmem:[%s6148_s7 + $0xd0] sm:$0xff] }
 0x220   :  { %600 = vmatpush.bf16.msra.mxu0 %v4244_v41  ;;  %613 = vmatpush.bf16.msra.mxu1 %v4248_v42  ;;  %v5609_v38 = vld [vmem:[%s6148_s7 + $0x10] sm:$0xff]  ;;  %v5608_v41 = vld [vmem:[%s6148_s7 + $0x8] sm:$0xff] }
 0x221   :  { %v5616_v42 = vld [vmem:[%s6148_s7 + $0x48] sm:$0xff] }
 0x223   :  { %575 = vmatpush.bf16.msra.mxu2 %v4172_v49  ;;  %588 = vmatpush.bf16.msra.mxu3 %v4176_v50  ;;  %v5646_v49 = vld [vmem:[%s6148_s7 + $0x138] sm:$0xff] }
 0x224   :  { %601 = vmatpush.bf16.msra.mxu0 %v4180_v51  ;;  %614 = vmatpush.bf16.msra.mxu1 %v4184_v52  ;;  %v5654_v50 = vld [vmem:[%s6148_s7 + $0x178] sm:$0xff]  ;;  %v5661_v51 = vld [vmem:[%s6148_s7 + $0x1b0] sm:$0xff] }
 0x225   :  { %v5669_v52 = vld [vmem:[%s6148_s7 + $0x1f0] sm:$0xff] }
 0x22d   :  { %4269 = vmatmul.msk.bf16.vlgmr.msrb.gmra.mxu2 %vm175_vm1, %v6103_v25  ;;  %4270 = vmatmul.msk.bf16.vlgmr.msrb.gmra.mxu3 %vm175_vm1, %v6103_v25 }
 0x22e   :  { %4271 = vmatmul.msk.bf16.vlgmr.msrb.gmra.mxu0 %vm175_vm1, %v6103_v25  ;;  %4272 = vmatmul.msk.bf16.vlgmr.msrb.gmra.mxu1 %vm175_vm1, %v6103_v25 }
 0x22f   :  { %626 = vmatpush.bf16.msrb.mxu2 %v4252_v61  ;;  %639 = vmatpush.bf16.msrb.mxu3 %v4256_v62  ;;  %v5643_v61 = vld [vmem:[%s6148_s7 + $0x120] sm:$0xff] }
 0x230   :  { %652 = vmatpush.bf16.msrb.mxu0 %v4260_v1  ;;  %665 = vmatpush.bf16.msrb.mxu1 %v4264_v2  ;;  %v5651_v62 = vld [vmem:[%s6148_s7 + $0x160] sm:$0xff]  ;;  %v5657_v1 = vld [vmem:[%s6148_s7 + $0x190] sm:$0xff] }
 0x231   :  { %v5665_v2 = vld [vmem:[%s6148_s7 + $0x1d0] sm:$0xff] }
 0x233   :  { %627 = vmatpush.bf16.msrb.mxu2 %v4188_v9  ;;  %640 = vmatpush.bf16.msrb.mxu3 %v4192_v10  ;;  %v5655_v9 = vld [vmem:[%s6148_s7 + $0x180] sm:$0xff] }
 0x234   :  { %653 = vmatpush.bf16.msrb.mxu0 %v4196_v11  ;;  %666 = vmatpush.bf16.msrb.mxu1 %v4200_v12  ;;  %v5663_v10 = vld [vmem:[%s6148_s7 + $0x1c0] sm:$0xff]  ;;  %v5640_v11 = vld [vmem:[%s6148_s7 + $0x108] sm:$0xff] }
 0x235   :  { %v5648_v12 = vld [vmem:[%s6148_s7 + $0x148] sm:$0xff] }
 0x23d   :  { %4273 = vmatmul.msk.bf16.vlgmr.msra.gmra.mxu2 %vm175_vm1, %v6103_v25  ;;  %4274 = vmatmul.msk.bf16.vlgmr.msra.gmra.mxu3 %vm175_vm1, %v6103_v25 }
 0x23e   :  { %4275 = vmatmul.msk.bf16.vlgmr.msra.gmra.mxu0 %vm175_vm1, %v6103_v25  ;;  %4276 = vmatmul.msk.bf16.vlgmr.msra.gmra.mxu1 %vm175_vm1, %v6103_v25 }
 0x23f   :  { %1758 = vmatpush.bf16.msra.mxu0 %v5630_v13  ;;  %1771 = vmatpush.bf16.msra.mxu1 %v5638_v14  ;;  %v5639_v13 = vld [vmem:[%s6148_s7 + $0x100] sm:$0xff] }
 0x240   :  { %1732 = vmatpush.bf16.msra.mxu2 %v5614_v15  ;;  %1745 = vmatpush.bf16.msra.mxu3 %v5622_v16  ;;  %v5647_v14 = vld [vmem:[%s6148_s7 + $0x140] sm:$0xff] }
 0x241   :  { %v6236_v15 = vld [vmem:[%s6233_s11] sm:$0xff] }
 0x242   :  { %v271_v16 = vperm.slane %v6236_v15, 2 }
 0x243   :  { %1759 = vmatpush.bf16.msra.mxu0 %v5629_v17  ;;  %1772 = vmatpush.bf16.msra.mxu1 %v5637_v18  ;;  %v272_v17 = vperm.slane %v6236_v15, 3 }
 0x244   :  { %1733 = vmatpush.bf16.msra.mxu2 %v5613_v19  ;;  %1746 = vmatpush.bf16.msra.mxu3 %v5621_v20 }
 0x247   :  { %1760 = vmatpush.bf16.msra.mxu0 %v5628_v21  ;;  %1773 = vmatpush.bf16.msra.mxu1 %v5636_v23  ;;  %v269_v23 = vperm.slane %v6236_v15, 0 }
 0x248   :  { %1734 = vmatpush.bf16.msra.mxu2 %v5612_v24  ;;  %1747 = vmatpush.bf16.msra.mxu3 %v5620_v26  ;;  %v270_v24 = vperm.slane %v6236_v15, 1 }
 0x24b   :  { %1761 = vmatpush.bf16.msra.mxu0 %v5627_v27  ;;  %1774 = vmatpush.bf16.msra.mxu1 %v5635_v28  ;;  %v5694_v28 = vld [vmem:[%s6148_s7 + $0x2b8] sm:$0xff] }
 0x24c   :  { %1735 = vmatpush.bf16.msra.mxu2 %v5611_v29  ;;  %1748 = vmatpush.bf16.msra.mxu3 %v5619_v30  ;;  %v5702_v29 = vld [vmem:[%s6148_s7 + $0x2f8] sm:$0xff] }
 0x24d   :  { %4277 = vmatmul.msk.bf16.vlgmr.msrb.gmra.mxu2 %vm175_vm1, %v6103_v25  ;;  %4278 = vmatmul.msk.bf16.vlgmr.msrb.gmra.mxu3 %vm175_vm1, %v6103_v25 }
 0x24e   :  { %4279 = vmatmul.msk.bf16.vlgmr.msrb.gmra.mxu0 %vm175_vm1, %v6103_v25  ;;  %4280 = vmatmul.msk.bf16.vlgmr.msrb.gmra.mxu1 %vm175_vm1, %v6103_v25  ;;  %v5632_v25 = vld [vmem:[%s6148_s7 + $0xc8] sm:$0xff] }
 0x24f   :  { %1762 = vmatpush.bf16.msra.mxu0 %v5626_v31  ;;  %1775 = vmatpush.bf16.msra.mxu1 %v5634_v32 }
 0x250   :  { %1736 = vmatpush.bf16.msra.mxu2 %v5610_v34  ;;  %1749 = vmatpush.bf16.msra.mxu3 %v5618_v35 }
 0x253   :  { %1763 = vmatpush.bf16.msra.mxu0 %v5625_v36  ;;  %1776 = vmatpush.bf16.msra.mxu1 %v5633_v37 }
 0x254   :  { %1737 = vmatpush.bf16.msra.mxu2 %v5609_v38  ;;  %1750 = vmatpush.bf16.msra.mxu3 %v5617_v39 }
 0x257   :  { %1764 = vmatpush.bf16.msra.mxu0 %v5624_v40  ;;  %1777 = vmatpush.bf16.msra.mxu1 %v5632_v25  ;;  %v5693_v25 = vld [vmem:[%s6148_s7 + $0x2b0] sm:$0xff] }
 0x258   :  { %1738 = vmatpush.bf16.msra.mxu2 %v5608_v41  ;;  %1751 = vmatpush.bf16.msra.mxu3 %v5616_v42  ;;  %v5701_v41 = vld [vmem:[%s6148_s7 + $0x2f0] sm:$0xff] }
 0x25b   :  { %1765 = vmatpush.bf16.msra.mxu0 %v5623_v43  ;;  %1778 = vmatpush.bf16.msra.mxu1 %v5631_v44  ;;  %v5678_v44 = vld [vmem:[%s6148_s7 + $0x238] sm:$0xff] }
 0x25c   :  { %1739 = vmatpush.bf16.msra.mxu2 %v5607_v47  ;;  %1752 = vmatpush.bf16.msra.mxu3 %v5615_v48  ;;  %v5700_v47 = vld [vmem:[%s6148_s7 + $0x2e8] sm:$0xff] }
 0x25f   :  { %1810 = vmatpush.bf16.msrb.mxu0 %v5662_v45  ;;  %1823 = vmatpush.bf16.msrb.mxu1 %v5670_v46  ;;  %v5686_v45 = vld [vmem:[%s6148_s7 + $0x278] sm:$0xff]  ;;  %v5692_v46 = vld [vmem:[%s6148_s7 + $0x2a8] sm:$0xff] }
 0x260   :  { %1784 = vmatpush.bf16.msrb.mxu2 %v5646_v49  ;;  %1797 = vmatpush.bf16.msrb.mxu3 %v5654_v50  ;;  %v275_v50 = vperm.slane %v6236_v15, 6 }
 0x263   :  { %1811 = vmatpush.bf16.msrb.mxu0 %v5661_v51  ;;  %1824 = vmatpush.bf16.msrb.mxu1 %v5669_v52  ;;  %v276_v51 = vperm.slane %v6236_v15, 7  ;;  %v5677_v52 = vld [vmem:[%s6148_s7 + $0x230] sm:$0xff] }
 0x264   :  { %1785 = vmatpush.bf16.msrb.mxu2 %v5645_v53  ;;  %1798 = vmatpush.bf16.msrb.mxu3 %v5653_v54  ;;  %v5685_v53 = vld [vmem:[%s6148_s7 + $0x270] sm:$0xff] }
 0x267   :  { %1812 = vmatpush.bf16.msrb.mxu0 %v5660_v55  ;;  %1825 = vmatpush.bf16.msrb.mxu1 %v5668_v56  ;;  %v5691_v56 = vld [vmem:[%s6148_s7 + $0x2a0] sm:$0xff] }
 0x268   :  { %1786 = vmatpush.bf16.msrb.mxu2 %v5644_v57  ;;  %1799 = vmatpush.bf16.msrb.mxu3 %v5652_v58  ;;  %v5699_v57 = vld [vmem:[%s6148_s7 + $0x2e0] sm:$0xff] }
 0x26b   :  { %1813 = vmatpush.bf16.msrb.mxu0 %v5659_v59  ;;  %1826 = vmatpush.bf16.msrb.mxu1 %v5667_v60  ;;  %v5676_v60 = vld [vmem:[%s6148_s7 + $0x228] sm:$0xff] }
 0x26c   :  { %1787 = vmatpush.bf16.msrb.mxu2 %v5643_v61  ;;  %1800 = vmatpush.bf16.msrb.mxu3 %v5651_v62  ;;  %v5684_v61 = vld [vmem:[%s6148_s7 + $0x268] sm:$0xff]  ;;  %v273_v62 = vperm.slane %v6236_v15, 4 }
 0x26f   :  { %1814 = vmatpush.bf16.msrb.mxu0 %v5658_v63  ;;  %1827 = vmatpush.bf16.msrb.mxu1 %v5666_v0  ;;  %v274_v63 = vperm.slane %v6236_v15, 5 }
 0x270   :  { %1788 = vmatpush.bf16.msrb.mxu2 %v5642_v3  ;;  %1801 = vmatpush.bf16.msrb.mxu3 %v5650_v4  ;;  %v5698_v3 = vld [vmem:[%s6148_s7 + $0x2d8] sm:$0xff] }
 0x273   :  { %1815 = vmatpush.bf16.msrb.mxu0 %v5657_v1  ;;  %1828 = vmatpush.bf16.msrb.mxu1 %v5665_v2  ;;  %v5690_v2 = vld [vmem:[%s6148_s7 + $0x298] sm:$0xff] }
 0x274   :  { %1789 = vmatpush.bf16.msrb.mxu2 %v5641_v7  ;;  %1802 = vmatpush.bf16.msrb.mxu3 %v5649_v8 }
 0x277   :  { %1816 = vmatpush.bf16.msrb.mxu0 %v5656_v5  ;;  %1829 = vmatpush.bf16.msrb.mxu1 %v5664_v6 }
 0x278   :  { %1790 = vmatpush.bf16.msrb.mxu2 %v5640_v11  ;;  %1803 = vmatpush.bf16.msrb.mxu3 %v5648_v12  ;;  %v5683_v11 = vld [vmem:[%s6148_s7 + $0x260] sm:$0xff] }
 0x27b   :  { %1817 = vmatpush.bf16.msrb.mxu0 %v5655_v9  ;;  %1830 = vmatpush.bf16.msrb.mxu1 %v5663_v10  ;;  %v5675_v10 = vld [vmem:[%s6148_s7 + $0x220] sm:$0xff] }
 0x27c   :  { %1791 = vmatpush.bf16.msrb.mxu2 %v5639_v13  ;;  %1804 = vmatpush.bf16.msrb.mxu3 %v5647_v14 }
 0x29b   :  { %v499_v18 = vpop.f32.mrf.mxu0  ;;  %v512_v19 = vpop.f32.mrf.mxu1 }
 0x29c   :  { %v500_v20 = vadd.f32 %v499_v18, %v271_v16  ;;  %v513_v21 = vadd.f32 %v512_v19, %v272_v17  ;;  %v5689_v16 = vld [vmem:[%s6148_s7 + $0x290] sm:$0xff] }
 0x29d   :  { %v5697_v17 = vld [vmem:[%s6148_s7 + $0x2d0] sm:$0xff] }
 0x29e   :  { %v674_v26 = vmax.f32 %v500_v20, 0.0  ;;  %v675_v27 = vmax.f32 %v513_v21, 0.0  ;;  %v5674_v20 = vld [vmem:[%s6148_s7 + $0x218] sm:$0xff] }
 0x29f   :  { %v5682_v21 = vld [vmem:[%s6148_s7 + $0x258] sm:$0xff] }
 0x2a0   :  { %v690_v30 = vpack.c.bf16 %v674_v26, %v674_v26  ;;  %v691_v31 = vpack.c.bf16 %v675_v27, %v675_v27  ;;  %v473_v32 = vpop.f32.mrf.mxu2  ;;  %v486_v34 = vpop.f32.mrf.mxu3  ;;  %v5696_v26 = vld [vmem:[%s6148_s7 + $0x2c8] sm:$0xff] }
 0x2a1   :  { %v474_v35 = vadd.f32 %v473_v32, %v269_v23  ;;  %v487_v36 = vadd.f32 %v486_v34, %v270_v24  ;;  %v6274_v23 = vld [vmem:[%s6233_s11 + $0x8] sm:$0xff]  ;;  %v5681_v32 = vld [vmem:[%s6148_s7 + $0x250] sm:$0xff]  ;;  %s6665_s11 = sld [smem:[%s6716_s0 + %s6004_s8]]  }
 0x2a2   :  { %1766 = vmatmul.bf16.vlgmr.msra.gmra.mxu0 %v690_v30  ;;  %1779 = vmatmul.bf16.vlgmr.msra.gmra.mxu1 %v691_v31  ;;  %v5688_v24 = vld [vmem:[%s6148_s7 + $0x288] sm:$0xff]  ;;  %v280_v30 = vperm.slane %v6274_v23, 3  ;;  %v5673_v31 = vld [vmem:[%s6148_s7 + $0x210] sm:$0xff] }
 0x2a3   :  { %v672_v37 = vmax.f32 %v474_v35, 0.0  ;;  %v673_v38 = vmax.f32 %v487_v36, 0.0  ;;  %1862 = vmatpush.bf16.msra.mxu0 %v5694_v28  ;;  %1875 = vmatpush.bf16.msra.mxu1 %v5702_v29  ;;  %v501_v39 = vpop.f32.mrf.mxu0  ;;  %v514_v40 = vpop.f32.mrf.mxu1  ;;  %v279_v29 = vperm.slane %v6274_v23, 2  ;;  %v5687_v36 = vld [vmem:[%s6148_s7 + $0x280] sm:$0xff] }
 0x2a4   :  { %v5726_v40 = vld [vmem:[%s6148_s7 + $0x3b8] sm:$0xff] }
 0x2a5   :  { %v688_v42 = vpack.c.bf16 %v672_v37, %v672_v37  ;;  %v689_v43 = vpack.c.bf16 %v673_v38, %v673_v38  ;;  %v5695_v37 = vld [vmem:[%s6148_s7 + $0x2c0] sm:$0xff] }
 0x2a7   :  { %1863 = vmatpush.bf16.msra.mxu0 %v5693_v25  ;;  %1876 = vmatpush.bf16.msra.mxu1 %v5701_v41  ;;  %v5734_v25 = vld [vmem:[%s6148_s7 + $0x3f8] sm:$0xff]  ;;  %v5672_v41 = vld [vmem:[%s6148_s7 + $0x208] sm:$0xff] }
 0x2a8   :  { %1740 = vmatmul.bf16.vlgmr.msra.gmra.mxu2 %v688_v42  ;;  %1753 = vmatmul.bf16.vlgmr.msra.gmra.mxu3 %v689_v43  ;;  %v475_v48 = vpop.f32.mrf.mxu2  ;;  %v488_v49 = vpop.f32.mrf.mxu3  ;;  %v5680_v42 = vld [vmem:[%s6148_s7 + $0x248] sm:$0xff]  ;;  %v277_v43 = vperm.slane %v6274_v23, 0 }
 0x2a9   :  { %1836 = vmatpush.bf16.msra.mxu2 %v5678_v44  ;;  %1849 = vmatpush.bf16.msra.mxu3 %v5686_v45  ;;  %v278_v44 = vperm.slane %v6274_v23, 1 }
 0x2ab   :  { %1864 = vmatpush.bf16.msra.mxu0 %v5692_v46  ;;  %1877 = vmatpush.bf16.msra.mxu1 %v5700_v47  ;;  %v551_v54 = vpop.f32.mrf.mxu0  ;;  %v564_v55 = vpop.f32.mrf.mxu1 }
 0x2ac   :  { %v552_v58 = vadd.f32 %v551_v54, %v275_v50  ;;  %v565_v59 = vadd.f32 %v564_v55, %v276_v51  ;;  %v5725_v51 = vld [vmem:[%s6148_s7 + $0x3b0] sm:$0xff]  ;;  %v5671_v55 = vld [vmem:[%s6148_s7 + $0x200] sm:$0xff] }
 0x2ad   :  { %1837 = vmatpush.bf16.msra.mxu2 %v5677_v52  ;;  %1850 = vmatpush.bf16.msra.mxu3 %v5685_v53  ;;  %v5733_v52 = vld [vmem:[%s6148_s7 + $0x3f0] sm:$0xff] }
 0x2ae   :  { %v678_v0 = vmax.f32 %v552_v58, 0.0  ;;  %v679_v1 = vmax.f32 %v565_v59, 0.0  ;;  %v5718_v58 = vld [vmem:[%s6148_s7 + $0x378] sm:$0xff] }
 0x2af   :  { %1865 = vmatpush.bf16.msra.mxu0 %v5691_v56  ;;  %1878 = vmatpush.bf16.msra.mxu1 %v5699_v57  ;;  %v5679_v56 = vld [vmem:[%s6148_s7 + $0x240] sm:$0xff]  ;;  %v5710_v57 = vld [vmem:[%s6148_s7 + $0x338] sm:$0xff] }
 0x2b0   :  { %v694_v4 = vpack.c.bf16 %v678_v0, %v678_v0  ;;  %v695_v5 = vpack.c.bf16 %v679_v1, %v679_v1  ;;  %v525_v6 = vpop.f32.mrf.mxu2  ;;  %v538_v7 = vpop.f32.mrf.mxu3  ;;  %v5732_v0 = vld [vmem:[%s6148_s7 + $0x3e8] sm:$0xff] }
 0x2b1   :  { %1838 = vmatpush.bf16.msra.mxu2 %v5676_v60  ;;  %1851 = vmatpush.bf16.msra.mxu3 %v5684_v61  ;;  %v526_v8 = vadd.f32 %v525_v6, %v273_v62  ;;  %v539_v9 = vadd.f32 %v538_v7, %v274_v63  ;;  %v5724_v63 = vld [vmem:[%s6148_s7 + $0x3a8] sm:$0xff]  ;;  %v5723_v7 = vld [vmem:[%s6148_s7 + $0x3a0] sm:$0xff] }
 0x2b2   :  { %1818 = vmatmul.bf16.vlgmr.msrb.gmra.mxu0 %v694_v4  ;;  %1831 = vmatmul.bf16.vlgmr.msrb.gmra.mxu1 %v695_v5  ;;  %v5717_v4 = vld [vmem:[%s6148_s7 + $0x370] sm:$0xff] }
 0x2b3   :  { %v676_v12 = vmax.f32 %v526_v8, 0.0  ;;  %v677_v13 = vmax.f32 %v539_v9, 0.0  ;;  %1866 = vmatpush.bf16.msra.mxu0 %v5690_v2  ;;  %1879 = vmatpush.bf16.msra.mxu1 %v5698_v3  ;;  %v553_v14 = vpop.f32.mrf.mxu0  ;;  %v566_v15 = vpop.f32.mrf.mxu1  ;;  %v5709_v3 = vld [vmem:[%s6148_s7 + $0x330] sm:$0xff]  ;;  %v5731_v8 = vld [vmem:[%s6148_s7 + $0x3e0] sm:$0xff]  ;;  %v5708_v9 = vld [vmem:[%s6148_s7 + $0x328] sm:$0xff] }
 0x2b4   :  { %v5730_v14 = vld [vmem:[%s6148_s7 + $0x3d8] sm:$0xff]  ;;  %v5707_v15 = vld [vmem:[%s6148_s7 + $0x320] sm:$0xff] }
 0x2b5   :  { %v692_v18 = vpack.c.bf16 %v676_v12, %v676_v12  ;;  %v693_v19 = vpack.c.bf16 %v677_v13, %v677_v13  ;;  %1839 = vmatpush.bf16.msra.mxu2 %v5675_v10  ;;  %1852 = vmatpush.bf16.msra.mxu3 %v5683_v11  ;;  %v5716_v10 = vld [vmem:[%s6148_s7 + $0x368] sm:$0xff]  ;;  %v5722_v13 = vld [vmem:[%s6148_s7 + $0x398] sm:$0xff] }
 0x2b7   :  { %1867 = vmatpush.bf16.msra.mxu0 %v5689_v16  ;;  %1880 = vmatpush.bf16.msra.mxu1 %v5697_v17  ;;  %v5715_v16 = vld [vmem:[%s6148_s7 + $0x360] sm:$0xff] }
 0x2b8   :  { %1792 = vmatmul.bf16.vlgmr.msrb.gmra.mxu2 %v692_v18  ;;  %1805 = vmatmul.bf16.vlgmr.msrb.gmra.mxu3 %v693_v19  ;;  %v527_v27 = vpop.f32.mrf.mxu2  ;;  %v540_v28 = vpop.f32.mrf.mxu3  ;;  %v5721_v19 = vld [vmem:[%s6148_s7 + $0x390] sm:$0xff] }
 0x2b9   :  { %1840 = vmatpush.bf16.msra.mxu2 %v5674_v20  ;;  %1853 = vmatpush.bf16.msra.mxu3 %v5682_v21  ;;  %v5729_v20 = vld [vmem:[%s6148_s7 + $0x3d0] sm:$0xff]  ;;  %v283_v21 = vperm.slane %v6274_v23, 6  ;;  %v5714_v27 = vld [vmem:[%s6148_s7 + $0x358] sm:$0xff] }
 0x2bb   :  { %1868 = vmatpush.bf16.msra.mxu0 %v5688_v24  ;;  %1881 = vmatpush.bf16.msra.mxu1 %v5696_v26  ;;  %v603_v34 = vpop.f32.mrf.mxu0  ;;  %v616_v35 = vpop.f32.mrf.mxu1  ;;  %v284_v24 = vperm.slane %v6274_v23, 7  ;;  %v5706_v26 = vld [vmem:[%s6148_s7 + $0x318] sm:$0xff] }
 0x2bc   :  { %v604_v38 = vadd.f32 %v603_v34, %v279_v29  ;;  %v617_v39 = vadd.f32 %v616_v35, %v280_v30  ;;  %v5720_v30 = vld [vmem:[%s6148_s7 + $0x388] sm:$0xff]  ;;  %v5705_v35 = vld [vmem:[%s6148_s7 + $0x310] sm:$0xff] }
 0x2bd   :  { %1841 = vmatpush.bf16.msra.mxu2 %v5673_v31  ;;  %1854 = vmatpush.bf16.msra.mxu3 %v5681_v32  ;;  %v5728_v31 = vld [vmem:[%s6148_s7 + $0x3c8] sm:$0xff] }
 0x2be   :  { %v682_v45 = vmax.f32 %v604_v38, 0.0  ;;  %v683_v46 = vmax.f32 %v617_v39, 0.0  ;;  %v282_v38 = vperm.slane %v6274_v23, 5 }
 0x2bf   :  { %1869 = vmatpush.bf16.msra.mxu0 %v5687_v36  ;;  %1882 = vmatpush.bf16.msra.mxu1 %v5695_v37  ;;  %v5713_v36 = vld [vmem:[%s6148_s7 + $0x350] sm:$0xff]  ;;  %v281_v37 = vperm.slane %v6274_v23, 4 }
 0x2c0   :  { %v698_v47 = vpack.c.bf16 %v682_v45, %v682_v45  ;;  %v699_v48 = vpack.c.bf16 %v683_v46, %v683_v46  ;;  %v577_v49 = vpop.f32.mrf.mxu2  ;;  %v590_v50 = vpop.f32.mrf.mxu3  ;;  %v5712_v45 = vld [vmem:[%s6148_s7 + $0x348] sm:$0xff] }
 0x2c1   :  { %1842 = vmatpush.bf16.msra.mxu2 %v5672_v41  ;;  %1855 = vmatpush.bf16.msra.mxu3 %v5680_v42  ;;  %v578_v53 = vadd.f32 %v577_v49, %v277_v43  ;;  %v591_v54 = vadd.f32 %v590_v50, %v278_v44  ;;  %v5727_v41 = vld [vmem:[%s6148_s7 + $0x3c0] sm:$0xff]  ;;  %v5704_v44 = vld [vmem:[%s6148_s7 + $0x308] sm:$0xff] }
 0x2c2   :  { %1870 = vmatmul.bf16.vlgmr.msra.gmra.mxu0 %v698_v47  ;;  %1883 = vmatmul.bf16.vlgmr.msra.gmra.mxu1 %v699_v48  ;;  %v5703_v49 = vld [vmem:[%s6148_s7 + $0x300] sm:$0xff] }
 0x2c3   :  { %1914 = vmatpush.bf16.msrb.mxu0 %v5726_v40  ;;  %1927 = vmatpush.bf16.msrb.mxu1 %v5734_v25  ;;  %v680_v59 = vmax.f32 %v578_v53, 0.0  ;;  %v681_v60 = vmax.f32 %v591_v54, 0.0  ;;  %v605_v61 = vpop.f32.mrf.mxu0  ;;  %v618_v62 = vpop.f32.mrf.mxu1  ;;  %v5719_v25 = vld [vmem:[%s6148_s7 + $0x380] sm:$0xff] }
 0x2c4   :  { %v5711_v50 = vld [vmem:[%s6148_s7 + $0x340] sm:$0xff]  ;;  %s4116_s7 = sld [smem:[%s6716_s0 + %s6003_s4]]  }
 0x2c5   :  { %v696_v1 = vpack.c.bf16 %v680_v59, %v680_v59  ;;  %v697_v2 = vpack.c.bf16 %v681_v60, %v681_v60  ;;  %1843 = vmatpush.bf16.msra.mxu2 %v5671_v55  ;;  %1856 = vmatpush.bf16.msra.mxu3 %v5679_v56 }
 0x2c7   :  { %1915 = vmatpush.bf16.msrb.mxu0 %v5725_v51  ;;  %1928 = vmatpush.bf16.msrb.mxu1 %v5733_v52 }
 0x2c8   :  { %v579_v5 = vpop.f32.mrf.mxu2  ;;  %v592_v6 = vpop.f32.mrf.mxu3  ;;  %1844 = vmatmul.bf16.vlgmr.msra.gmra.mxu2 %v696_v1  ;;  %1857 = vmatmul.bf16.vlgmr.msra.gmra.mxu3 %v697_v2 }
 0x2c9   :  { %1888 = vmatpush.bf16.msrb.mxu2 %v5710_v57  ;;  %1901 = vmatpush.bf16.msrb.mxu3 %v5718_v58 }
 0x2cb   :  { %1916 = vmatpush.bf16.msrb.mxu0 %v5724_v63  ;;  %1929 = vmatpush.bf16.msrb.mxu1 %v5732_v0  ;;  %v655_v11 = vpop.f32.mrf.mxu0  ;;  %v668_v12 = vpop.f32.mrf.mxu1 }
 0x2cc   :  { %v656_v32 = vadd.f32 %v655_v11, %v283_v21  ;;  %v669_v34 = vadd.f32 %v668_v12, %v284_v24 }
 0x2cd   :  { %1889 = vmatpush.bf16.msrb.mxu2 %v5709_v3  ;;  %1902 = vmatpush.bf16.msrb.mxu3 %v5717_v4  ;;  %v5959_v3 = vld [vmem:[%s6251_s15] ss:$0 sm:$0xff]  ;;  %s6686_s15 = sld [smem:[%s6716_s0 + %s6005_s12]]  }
 0x2ce   :  { %v686_v42 = vmax.f32 %v656_v32, 0.0  ;;  %v687_v43 = vmax.f32 %v669_v34, 0.0 }
 0x2cf   :  { %1917 = vmatpush.bf16.msrb.mxu0 %v5723_v7  ;;  %1930 = vmatpush.bf16.msrb.mxu1 %v5731_v8 }
 0x2d0   :  { %v629_v17 = vpop.f32.mrf.mxu2  ;;  %v642_v18 = vpop.f32.mrf.mxu3  ;;  %v702_v48 = vpack.c.bf16 %v686_v42, %v686_v42  ;;  %v703_v23 = vpack.c.bf16 %v687_v43, %v687_v43 }
 0x2d1   :  { %1890 = vmatpush.bf16.msrb.mxu2 %v5708_v9  ;;  %1903 = vmatpush.bf16.msrb.mxu3 %v5716_v10  ;;  %v630_v46 = vadd.f32 %v629_v17, %v281_v37  ;;  %v643_v47 = vadd.f32 %v642_v18, %v282_v38 }
 0x2d3   :  { %1918 = vmatpush.bf16.msrb.mxu0 %v5722_v13  ;;  %1931 = vmatpush.bf16.msrb.mxu1 %v5730_v14  ;;  %v657_v28 = vpop.f32.mrf.mxu0  ;;  %v670_v29 = vpop.f32.mrf.mxu1  ;;  %v684_v51 = vmax.f32 %v630_v46, 0.0  ;;  %v685_v52 = vmax.f32 %v643_v47, 0.0 }
 0x2d5   :  { %1891 = vmatpush.bf16.msrb.mxu2 %v5707_v15  ;;  %1904 = vmatpush.bf16.msrb.mxu3 %v5715_v16  ;;  %v700_v53 = vpack.c.bf16 %v684_v51, %v684_v51  ;;  %v701_v54 = vpack.c.bf16 %v685_v52, %v685_v52 }
 0x2d7   :  { %1919 = vmatpush.bf16.msrb.mxu0 %v5721_v19  ;;  %1932 = vmatpush.bf16.msrb.mxu1 %v5729_v20 }
 0x2d8   :  { %v631_v39 = vpop.f32.mrf.mxu2  ;;  %v644_v40 = vpop.f32.mrf.mxu3 }
 0x2d9   :  { %1892 = vmatpush.bf16.msrb.mxu2 %v5706_v26  ;;  %1905 = vmatpush.bf16.msrb.mxu3 %v5714_v27 }
 0x2db   :  { %1920 = vmatpush.bf16.msrb.mxu0 %v5720_v30  ;;  %1933 = vmatpush.bf16.msrb.mxu1 %v5728_v31 }
 0x2dd   :  { %1893 = vmatpush.bf16.msrb.mxu2 %v5705_v35  ;;  %1906 = vmatpush.bf16.msrb.mxu3 %v5713_v36 }
 0x2df   :  { %1921 = vmatpush.bf16.msrb.mxu0 %v5719_v25  ;;  %1934 = vmatpush.bf16.msrb.mxu1 %v5727_v41 }
 0x2e1   :  { %1894 = vmatpush.bf16.msrb.mxu2 %v5704_v44  ;;  %1907 = vmatpush.bf16.msrb.mxu3 %v5712_v45 }
 0x2e2   :  { %1922 = vmatmul.bf16.vlgmr.msrb.gmra.mxu0 %v702_v48  ;;  %1935 = vmatmul.bf16.vlgmr.msrb.gmra.mxu1 %v703_v23 }
 0x2e5   :  { %1895 = vmatpush.bf16.msrb.mxu2 %v5703_v49  ;;  %1908 = vmatpush.bf16.msrb.mxu3 %v5711_v50  ;;  %v5735_v49 = vld [vmem:[%s4106_s1] sm:$0xff] }
 0x2e8   :  { %1896 = vmatmul.bf16.vlgmr.msrb.gmra.mxu2 %v700_v53  ;;  %1909 = vmatmul.bf16.vlgmr.msrb.gmra.mxu3 %v701_v54 }
 0x31f   :  { %v1767_v55 = vpop.f32.mrf.mxu0  ;;  %v1780_v56 = vpop.f32.mrf.mxu1 }
 0x327   :  { %v1769_v57 = vpop.f32.mrf.mxu0  ;;  %v1782_v58 = vpop.f32.mrf.mxu1 }
 0x32b   :  { %v1741_v59 = vpop.f32.mrf.mxu2  ;;  %v1754_v60 = vpop.f32.mrf.mxu3 }
 0x32c   :  { %v1742_v6 = vadd.f32 %v5959_v3, %v1741_v59  ;;  %v5960_v59 = vld [vmem:[%s6330_s19] ss:$0 sm:$0xff]  ;;  %s6695_s19 = sld [smem:[%s6716_s0 + %s6006_s16]]  }
 0x32e   :  { %v1755_v9 = vadd.f32 %v1754_v60, %v1742_v6 }
 0x32f   :  { %v1819_v61 = vpop.f32.mrf.mxu0  ;;  %v1832_v62 = vpop.f32.mrf.mxu1 }
 0x330   :  { %v1768_v12 = vadd.f32 %v1767_v55, %v1755_v9 }
 0x332   :  { %v1781_v15 = vadd.f32 %v1780_v56, %v1768_v12 }
 0x333   :  { %v1743_v63 = vpop.f32.mrf.mxu2  ;;  %v1756_v0 = vpop.f32.mrf.mxu3 }
 0x337   :  { %v1821_v1 = vpop.f32.mrf.mxu0  ;;  %v1834_v2 = vpop.f32.mrf.mxu1 }
 0x338   :  { %v5962_v2 = vld [vmem:[%s4107_s27] ss:$0 sm:$0xff]  ;;  %s4121_s27 = sld [smem:[%s6716_s0 + %s6008_s24]]  }
 0x33b   :  { %v1793_v4 = vpop.f32.mrf.mxu2  ;;  %v1806_v5 = vpop.f32.mrf.mxu3 }
 0x33c   :  { %v1794_v18 = vadd.f32 %v1793_v4, %v1781_v15  ;;  %v5753_v15 = vld [vmem:[%s6371_s13 + $0x84] sm:$0xf] }
 0x33e   :  { %v1807_v19 = vadd.f32 %v1806_v5, %v1794_v18  ;;  %v4876_v18 = vld [vmem:[%s6371_s13 + $0x88] sm:$0xf] }
 0x33f   :  { %v1871_v7 = vpop.f32.mrf.mxu0  ;;  %v1884_v8 = vpop.f32.mrf.mxu1 }
 0x340   :  { %v1820_v24 = vadd.f32 %v1819_v61, %v1807_v19  ;;  %v5961_v61 = vld [vmem:[%s6336_s23] ss:$0 sm:$0xff]  ;;  %v5762_v19 = vld [vmem:[%s6371_s13 + $0xc4] sm:$0xf0]  ;;  %s4117_s23 = sld [smem:[%s6716_s0 + %s6007_s20]]  }
 0x342   :  { %v1833_v26 = vadd.f32 %v1832_v62, %v1820_v24  ;;  %v5754_v24 = vld [vmem:[%s6371_s13 + $0x8c] sm:$0xf] }
 0x343   :  { %v1795_v10 = vpop.f32.mrf.mxu2  ;;  %v1808_v11 = vpop.f32.mrf.mxu3 }
 0x347   :  { %v1873_v13 = vpop.f32.mrf.mxu0  ;;  %v1886_v14 = vpop.f32.mrf.mxu1 }
 0x348   :  { %v4868_v13 = vld [vmem:[%s6371_s13 + $0x80] sm:$0xf] }
 0x349   :  { %v5761_v14 = vld [vmem:[%s6371_s13 + $0xbc] sm:$0xf0] }
 0x34b   :  { %v1845_v16 = vpop.f32.mrf.mxu2  ;;  %v1858_v17 = vpop.f32.mrf.mxu3 }
 0x34c   :  { %v1846_v27 = vadd.f32 %v1845_v16, %v1833_v26  ;;  %v4869_v16 = vor.u32 %v5761_v14, %v4868_v13  ;;  %v4878_v26 = vld [vmem:[%s6371_s13 + $0xc8] sm:$0xf0]  ;;  %v4900_v13 = vld [vmem:[%s6371_s13 + $0xa0] sm:$0xf] }
 0x34d   :  { %v5765_v14 = vld [vmem:[%s6371_s13 + $0xdc] sm:$0xf0] }
 0x34e   :  { %v1859_v30 = vadd.f32 %v1858_v17, %v1846_v27  ;;  %v4870_v17 = vld [vmem:[%s6371_s13 + $0xc0] sm:$0xf0]  ;;  %2281 = vmatpush.bf16.msra.mxu3 %v4869_v16  ;;  %v4881_v27 = vor.u32 %v5754_v24, %v4878_v26  ;;  %v4901_v24 = vor.u32 %v5765_v14, %v4900_v13 }
 0x34f   :  { %v4902_v16 = vld [vmem:[%s6371_s13 + $0xe0] sm:$0xf0] }
 0x350   :  { %v1872_v31 = vadd.f32 %v1871_v7, %v1859_v30  ;;  %v5737_v30 = vld [vmem:[%s6371_s13 + $0x4] sm:$0xf] }
 0x351   :  { %v5789_v13 = vld [vmem:[%s6466_s17 + $0xa0] sm:$0xff] }
 0x352   :  { %v1885_v35 = vadd.f32 %v1884_v8, %v1872_v31  ;;  %v5773_v14 = vld [vmem:[%s6466_s17 + $0x20] sm:$0xff] }
 0x353   :  { %v1847_v20 = vpop.f32.mrf.mxu2  ;;  %v1860_v21 = vpop.f32.mrf.mxu3 }
 0x354   :  { %v4873_v20 = vor.u32 %v5753_v15, %v4870_v17  ;;  %v4877_v21 = vor.u32 %v5762_v19, %v4876_v18  ;;  %v5757_v15 = vld [vmem:[%s6371_s13 + $0xa4] sm:$0xf]  ;;  %v4908_v17 = vld [vmem:[%s6371_s13 + $0xa8] sm:$0xf] }
 0x355   :  { %v5766_v19 = vld [vmem:[%s6371_s13 + $0xe4] sm:$0xf0]  ;;  %v4905_v26 = vor.u32 %v5757_v15, %v4902_v16  ;;  %v5797_v15 = vld [vmem:[%s6466_s17 + $0xe0] sm:$0xff]  ;;  %v5780_v16 = vld [vmem:[%s6466_s17 + $0x58] sm:$0xff] }
 0x356   :  { %2294 = vmatpush.bf16.msra.mxu0 %v4873_v20  ;;  %2307 = vmatpush.bf16.msra.mxu1 %v4877_v21  ;;  %v5758_v20 = vld [vmem:[%s6371_s13 + $0xac] sm:$0xf] }
 0x357   :  { %v4910_v21 = vld [vmem:[%s6371_s13 + $0xe8] sm:$0xf0] }
 0x35f   :  { %v1923_v28 = vpop.f32.mrf.mxu0  ;;  %v1936_v29 = vpop.f32.mrf.mxu1 }
 0x367   :  { %v1925_v32 = vpop.f32.mrf.mxu0  ;;  %v1938_v34 = vpop.f32.mrf.mxu1 }
 0x368   :  { %v4806_v32 = vld [vmem:[%s6371_s13 + $0x40] sm:$0xf0]  ;;  %v4812_v34 = vld [vmem:[%s6371_s13 + $0x8] sm:$0xf] }
 0x36b   :  { %v1897_v36 = vpop.f32.mrf.mxu2  ;;  %v1910_v37 = vpop.f32.mrf.mxu3 }
 0x36c   :  { %v1898_v38 = vadd.f32 %v1897_v36, %v1885_v35  ;;  %v5746_v35 = vld [vmem:[%s6371_s13 + $0x44] sm:$0xf0]  ;;  %v4809_v36 = vor.u32 %v5737_v30, %v4806_v32  ;;  %v4913_v30 = vor.u32 %v5758_v20, %v4910_v21  ;;  %v4838_v32 = vld [vmem:[%s6371_s13 + $0x60] sm:$0xf0]  ;;  %v5796_v20 = vld [vmem:[%s6466_s17 + $0xd8] sm:$0xff] }
 0x36d   :  { %v5779_v21 = vld [vmem:[%s6466_s17 + $0x50] sm:$0xff] }
 0x36e   :  { %v1911_v39 = vadd.f32 %v1910_v37, %v1898_v38  ;;  %v4813_v37 = vor.u32 %v5746_v35, %v4812_v34  ;;  %v5738_v38 = vld [vmem:[%s6371_s13 + $0xc] sm:$0xf]  ;;  %2295 = vmatpush.bf16.msra.mxu0 %v4809_v36  ;;  %v4844_v34 = vld [vmem:[%s6371_s13 + $0x28] sm:$0xf] }
 0x36f   :  { %v5750_v35 = vld [vmem:[%s6371_s13 + $0x64] sm:$0xf0]  ;;  %v5742_v36 = vld [vmem:[%s6371_s13 + $0x2c] sm:$0xf] }
 0x370   :  { %v1924_v40 = vadd.f32 %v1923_v28, %v1911_v39  ;;  %v4804_v28 = vld [vmem:[%s6371_s13] sm:$0xf]  ;;  %v4814_v39 = vld [vmem:[%s6371_s13 + $0x48] sm:$0xf0]  ;;  %2308 = vmatpush.bf16.msra.mxu1 %v4813_v37 }
 0x371   :  { %v4846_v37 = vld [vmem:[%s6371_s13 + $0x68] sm:$0xf0] }
 0x372   :  { %v1937_v25 = vadd.f32 %v1936_v29, %v1924_v40  ;;  %v5745_v29 = vld [vmem:[%s6371_s13 + $0x3c] sm:$0xf0]  ;;  %v4817_v40 = vor.u32 %v5738_v38, %v4814_v39 }
 0x373   :  { %v1899_v41 = vpop.f32.mrf.mxu2  ;;  %v1912_v42 = vpop.f32.mrf.mxu3  ;;  %v4805_v31 = vor.u32 %v5745_v29, %v4804_v28  ;;  %v5749_v28 = vld [vmem:[%s6371_s13 + $0x5c] sm:$0xf0]  ;;  %v4909_v29 = vor.u32 %v5766_v19, %v4908_v17  ;;  %v5788_v17 = vld [vmem:[%s6466_s17 + $0x98] sm:$0xff] }
 0x374   :  { %v1940_v43 = vadd.f32 %v1937_v25, %v6096_v33  ;;  %v5736_v33 = vld [vmem:[%s4106_s1 + $0x8] sm:$0xff]  ;;  %v4884_v41 = vld [vmem:[%s6371_s13 + $0x90] sm:$0xf]  ;;  %v5772_v19 = vld [vmem:[%s6466_s17 + $0x18] sm:$0xff]  ;;  %s4122_s1 = sld [smem:[%s6716_s0 + %s6009_s28]]  }
 0x375   :  { %2003 = vmatpush.bf16.msra.mxu2 %v5736_v33  ;;  %2282 = vmatpush.bf16.msra.mxu3 %v4805_v31  ;;  %v5763_v42 = vld [vmem:[%s6371_s13 + $0xcc] sm:$0xf0]  ;;  %v5741_v31 = vld [vmem:[%s6371_s13 + $0x24] sm:$0xf] }
 0x376   :  { %v1941_v44 = vsel %vm175_vm1, %v1940_v43, 0.0  ;;  %v4841_v39 = vor.u32 %v5741_v31, %v4838_v32  ;;  %v5777_v31 = vld [vmem:[%s6466_s17 + $0x40] sm:$0xff] }
 0x377   :  { %1942 = vadd.xlane.f32.xlu1 %v1941_v44  ;;  %v5785_v32 = vld [vmem:[%s6466_s17 + $0x80] sm:$0xff] }
 0x379   :  { %2004 = vmatpush.bf16.msra.mxu2 %v5735_v49  ;;  %v5756_v49 = vld [vmem:[%s6371_s13 + $0x9c] sm:$0xf] }
 0x37d   :  { %2320 = vmatpush.bf16.msrb.mxu2 %v4881_v27  ;;  %v4836_v27 = vld [vmem:[%s6371_s13 + $0x20] sm:$0xf] }
 0x37e   :  { %v4837_v38 = vor.u32 %v5749_v28, %v4836_v27  ;;  %v5795_v27 = vld [vmem:[%s6466_s17 + $0xd0] sm:$0xff]  ;;  %v5778_v28 = vld [vmem:[%s6466_s17 + $0x48] sm:$0xff] }
 0x381   :  { %2321 = vmatpush.bf16.msrb.mxu2 %v4817_v40  ;;  %v4845_v40 = vor.u32 %v5750_v35, %v4844_v34  ;;  %v5816_v34 = vld [vmem:[%s6466_s17 + $0x178] sm:$0xff] }
 0x382   :  { %v5824_v35 = vld [vmem:[%s6466_s17 + $0x1b8] sm:$0xff] }
 0x3ea   :  { %v1943_v45 = vpop.xlane.xlu1 %1942 }
 0x3eb   :  { %v1944_v46 = vmul.f32 %v1943_v45, %v6042_v22  ;;  %v4885_v45 = vor.u32 %v5763_v42, %v4884_v41  ;;  %v4916_v41 = vld [vmem:[%s6371_s13 + $0xb0] sm:$0xf] }
 0x3ec   :  { %v5767_v42 = vld [vmem:[%s6371_s13 + $0xec] sm:$0xf0] }
 0x3ed   :  { %v1945_v47 = vsub.f32 %v1940_v43, %v1944_v46  ;;  %v5755_v43 = vld [vmem:[%s6371_s13 + $0x94] sm:$0xf]  ;;  %2333 = vmatpush.bf16.msrb.mxu3 %v4885_v45  ;;  %v4924_v45 = vld [vmem:[%s6371_s13 + $0xb8] sm:$0xf] }
 0x3ee   :  { %v4886_v46 = vld [vmem:[%s6371_s13 + $0xd0] sm:$0xf0] }
 0x3ef   :  { %v1946_v48 = vmul.f32 %v1945_v47, %v1945_v47 }
 0x3f1   :  { %v1947_v23 = vsel %vm175_vm1, %v1946_v48, 0.0  ;;  %v5764_v48 = vld [vmem:[%s6371_s13 + $0xd4] sm:$0xf0] }
 0x3f2   :  { %1948 = vadd.xlane.f32.xlu1 %v1947_v23  ;;  %v4889_v23 = vor.u32 %v5755_v43, %v4886_v46  ;;  %v5759_v43 = vld [vmem:[%s6371_s13 + $0xb4] sm:$0xf]  ;;  %v5768_v46 = vld [vmem:[%s6371_s13 + $0xf4] sm:$0xf0] }
 0x3f4   :  { %2346 = vmatpush.bf16.msrb.mxu0 %v4889_v23  ;;  %v4917_v23 = vor.u32 %v5767_v42, %v4916_v41  ;;  %v5807_v41 = vld [vmem:[%s6466_s17 + $0x130] sm:$0xff] }
 0x3f5   :  { %v5831_v42 = vld [vmem:[%s6466_s17 + $0x1f0] sm:$0xff] }
 0x465   :  { %v1949_v50 = vpop.xlane.xlu1 %1948 }
 0x466   :  { %v1950_v51 = vmul.f32 %v1949_v50, %v6042_v22  ;;  %v4894_v50 = vld [vmem:[%s6371_s13 + $0xd8] sm:$0xf0] }
 0x468   :  { %v1951_v52 = vadd.f32 1e-05, %v1950_v51  ;;  %v4820_v51 = vld [vmem:[%s6371_s13 + $0x10] sm:$0xf] }
 0x46a   :  { %5974 = vrsqrt.f32 %v1951_v52  ;;  %vm1958_vm7 = vweird.f32 %v1951_v52 }
 0x470   :  { %v5975_v53 = vpop.eup %5974 }
 0x471   :  { %v1953_v54 = vmul.f32 %v5975_v53, %v1951_v52  ;;  %vm1959_vm6 = vweird.f32 %v5975_v53 }
 0x472   :  { %vm1960_vm8 = vmor %vm1958_vm7, %vm1959_vm6 }
 0x473   :  { %v1954_v55 = vmul.f32 %v5975_v53, %v1953_v54  ;;  %v5747_v54 = vld [vmem:[%s6371_s13 + $0x4c] sm:$0xf0] }
 0x475   :  { %v1955_v56 = vmul.f32 0.5, %v1954_v55  ;;  %v5739_v55 = vld [vmem:[%s6371_s13 + $0x14] sm:$0xf] }
 0x477   :  { %v1956_v57 = vsub.f32 1.5, %v1955_v56  ;;  %v4821_v56 = vor.u32 %v5747_v54, %v4820_v51  ;;  %v4925_v51 = vor.u32 %v5768_v46, %v4924_v45  ;;  %v4854_v54 = vld [vmem:[%s6371_s13 + $0x70] sm:$0xf0]  ;;  %v5806_v45 = vld [vmem:[%s6466_s17 + $0x128] sm:$0xff] }
 0x478   :  { %v5830_v46 = vld [vmem:[%s6466_s17 + $0x1e8] sm:$0xff] }
 0x479   :  { %v1957_v58 = vmul.f32 %v5975_v53, %v1956_v57  ;;  %v4822_v57 = vld [vmem:[%s6371_s13 + $0x50] sm:$0xf0]  ;;  %2334 = vmatpush.bf16.msrb.mxu3 %v4821_v56  ;;  %v5752_v56 = vld [vmem:[%s6371_s13 + $0x74] sm:$0xf0] }
 0x47b   :  { %v1961_v60 = vsel %vm1960_vm8, %v5975_v53, %v1957_v58  ;;  %v4897_v53 = vor.u32 %v5756_v49, %v4894_v50  ;;  %v4828_v58 = vld [vmem:[%s6371_s13 + $0x18] sm:$0xf]  ;;  %v4852_v49 = vld [vmem:[%s6371_s13 + $0x30] sm:$0xf] }
 0x47c   :  { %v1962_v62 = vmul.f32 %v1961_v60, %v1945_v47  ;;  %v4892_v47 = vld [vmem:[%s6371_s13 + $0x98] sm:$0xf]  ;;  %v4825_v60 = vor.u32 %v5739_v55, %v4822_v57  ;;  %v5751_v50 = vld [vmem:[%s6371_s13 + $0x6c] sm:$0xf0]  ;;  %v5744_v57 = vld [vmem:[%s6371_s13 + $0x3c] sm:$0xf] }
 0x47d   :  { %v4893_v33 = vor.u32 %v5764_v48, %v4892_v47  ;;  %v5760_v47 = vld [vmem:[%s6371_s13 + $0xbc] sm:$0xf]  ;;  %v4860_v55 = vld [vmem:[%s6371_s13 + $0x38] sm:$0xf] }
 0x47e   :  { %v1967_v63 = vmul.f32 %v5960_v59, %v1962_v62  ;;  %v5748_v59 = vld [vmem:[%s6371_s13 + $0x54] sm:$0xf0]  ;;  %v5740_v62 = vld [vmem:[%s6371_s13 + $0x1c] sm:$0xf]  ;;  %2347 = vmatpush.bf16.msrb.mxu0 %v4825_v60 }
 0x47f   :  { %2359 = vmatpush.bf16.msrb.mxu1 %v4893_v33  ;;  %v4926_v48 = vld [vmem:[%s6371_s13 + $0xf8] sm:$0xf0] }
 0x480   :  { %v1972_v0 = vadd.f32 %v5961_v61, %v1967_v63  ;;  %v4829_v61 = vor.u32 %v5748_v59, %v4828_v58  ;;  %v4830_v63 = vld [vmem:[%s6371_s13 + $0x58] sm:$0xf0]  ;;  %v4853_v59 = vor.u32 %v5751_v50, %v4852_v49 }
 0x481   :  { %v4862_v58 = vld [vmem:[%s6371_s13 + $0x78] sm:$0xf0] }
 0x482   :  { %v1973_v1 = vpack.c.bf16 %v1972_v0, %v1972_v0  ;;  %v5812_v49 = vld [vmem:[%s6466_s17 + $0x158] sm:$0xff] }
 0x483   :  { %2360 = vmatpush.bf16.msrb.mxu1 %v4829_v61  ;;  %v4861_v61 = vor.u32 %v5752_v56, %v4860_v55  ;;  %v5820_v50 = vld [vmem:[%s6466_s17 + $0x198] sm:$0xff]  ;;  %v5810_v55 = vld [vmem:[%s6466_s17 + $0x148] sm:$0xff] }
 0x484   :  { %4801 = vmatmul.msk.bf16.vlgmr.msra.gmra.mxu2 %vm175_vm1, %v1973_v1  ;;  %v5818_v56 = vld [vmem:[%s6466_s17 + $0x188] sm:$0xff] }
 0x485   :  { %2372 = vmatpush.bf16.msra.mxu2 %v4897_v53  ;;  %v5743_v53 = vld [vmem:[%s6371_s13 + $0x34] sm:$0xf] }
 0x486   :  { %v4857_v60 = vor.u32 %v5743_v53, %v4854_v54  ;;  %v5804_v53 = vld [vmem:[%s6466_s17 + $0x118] sm:$0xff] }
 0x487   :  { %v5828_v54 = vld [vmem:[%s6466_s17 + $0x1d8] sm:$0xff] }
 0x507   :  { %v2006_v3 = vpop.f32.mrf.mxu2 }
 0x508   :  { %v2007_v4 = vadd.f32 %v5962_v2, %v2006_v3 }
 0x50a   :  { %v2010_v5 = vadd.f32 %v2007_v4, %v1972_v0  ;;  %v4833_v0 = vor.u32 %v5740_v62, %v4830_v63  ;;  %v4865_v62 = vor.u32 %v5744_v57, %v4862_v58  ;;  %v5784_v63 = vld [vmem:[%s6466_s17 + $0x78] sm:$0xff]  ;;  %v5803_v57 = vld [vmem:[%s6466_s17 + $0x110] sm:$0xff] }
 0x50b   :  { %v5827_v58 = vld [vmem:[%s6466_s17 + $0x1d0] sm:$0xff] }
 0x50c   :  { %v2011_v6 = vsel %vm175_vm1, %v2010_v5, 0.0  ;;  %2373 = vmatpush.bf16.msra.mxu2 %v4833_v0  ;;  %v5792_v0 = vld [vmem:[%s6466_s17 + $0xb8] sm:$0xff] }
 0x50d   :  { %2012 = vadd.xlane.f32.xlu2 %v2011_v6 }
 0x50f   :  { %v2008_v7 = vpop.f32.mrf.mxu2 }
 0x510   :  { %v5963_v7 = vld [vmem:[%s6354_s5] ss:$0 sm:$0xff] }
 0x580   :  { %v2013_v8 = vpop.xlane.xlu2 %2012 }
 0x581   :  { %v2014_v9 = vmul.f32 %v2013_v8, %v6042_v22 }
 0x583   :  { %v6363_v10 = vsub.f32 %v2010_v5, %v2014_v9  ;;  %v5964_v9 = vld [vmem:[%s6359_s9] ss:$0 sm:$0xff] }
 0x585   :  { %v2016_v11 = vmul.f32 %v6363_v10, %v6363_v10 }
 0x587   :  { %v2017_v12 = vsel %vm175_vm1, %v2016_v11, 0.0 }
 0x588   :  { %2018 = vadd.xlane.f32.xlu2 %v2017_v12 }
 0x5fb   :  { %v2019_v25 = vpop.xlane.xlu2 %2018 }
 0x5fc   :  { %v2020_v44 = vmul.f32 %v2019_v25, %v6042_v22  ;;  %v4849_v25 = vor.u32 %v5742_v36, %v4846_v37  ;;  %v5769_v36 = vld [vmem:[%s6466_s17] sm:$0xff] }
 0x5fd   :  { %v5793_v37 = vld [vmem:[%s6466_s17 + $0xc0] sm:$0xff] }
 0x5fe   :  { %v2021_v52 = vadd.f32 1e-05, %v2020_v44  ;;  %v4918_v44 = vld [vmem:[%s6371_s13 + $0xf0] sm:$0xf0] }
 0x5ff   :  { %v4921_v33 = vor.u32 %v5759_v43, %v4918_v44  ;;  %v5814_v43 = vld [vmem:[%s6466_s17 + $0x168] sm:$0xff] }
 0x600   :  { %5976 = vrsqrt.f32 %v2021_v52  ;;  %vm2028_vm10 = vweird.f32 %v2021_v52  ;;  %v5822_v44 = vld [vmem:[%s6466_s17 + $0x1a8] sm:$0xff] }
 0x606   :  { %v5977_v1 = vpop.eup %5976 }
 0x607   :  { %v2023_v2 = vmul.f32 %v5977_v1, %v2021_v52  ;;  %vm2029_vm9 = vweird.f32 %v5977_v1  ;;  %v4929_v52 = vor.u32 %v5760_v47, %v4926_v48  ;;  %v5813_v47 = vld [vmem:[%s6466_s17 + $0x160] sm:$0xff] }
 0x608   :  { %vm2030_vm11 = vmor %vm2028_vm10, %vm2029_vm9  ;;  %v5821_v48 = vld [vmem:[%s6466_s17 + $0x1a0] sm:$0xff] }
 0x609   :  { %v2024_v3 = vmul.f32 %v5977_v1, %v2023_v2  ;;  %v5800_v2 = vld [vmem:[%s6466_s17 + $0xf8] sm:$0xff] }
 0x60b   :  { %v2025_v4 = vmul.f32 0.5, %v2024_v3  ;;  %v5783_v3 = vld [vmem:[%s6466_s17 + $0x70] sm:$0xff] }
 0x60d   :  { %v2026_v5 = vsub.f32 1.5, %v2025_v4  ;;  %v5791_v4 = vld [vmem:[%s6466_s17 + $0xb0] sm:$0xff] }
 0x60f   :  { %v2027_v6 = vmul.f32 %v5977_v1, %v2026_v5  ;;  %v5775_v5 = vld [vmem:[%s6466_s17 + $0x30] sm:$0xff] }
 0x611   :  { %v2031_v8 = vsel %vm2030_vm11, %v5977_v1, %v2027_v6  ;;  %v5776_v1 = vld [vmem:[%s6466_s17 + $0x38] sm:$0xff]  ;;  %v5799_v6 = vld [vmem:[%s6466_s17 + $0xf0] sm:$0xff] }
 0x612   :  { %v2032_v11 = vmul.f32 %v2031_v8, %v6363_v10  ;;  %v5790_v8 = vld [vmem:[%s6466_s17 + $0xa8] sm:$0xff] }
 0x614   :  { %v2037_v12 = vmul.f32 %v5963_v7, %v2032_v11  ;;  %v5782_v7 = vld [vmem:[%s6466_s17 + $0x68] sm:$0xff] }
 0x615   :  { %v5798_v11 = vld [vmem:[%s6466_s17 + $0xe8] sm:$0xff] }
 0x616   :  { %v6414_v18 = vadd.f32 %v5964_v9, %v2037_v12  ;;  %v5774_v9 = vld [vmem:[%s6466_s17 + $0x28] sm:$0xff]  ;;  %v5781_v12 = vld [vmem:[%s6466_s17 + $0x60] sm:$0xff] }
 0x618   :  { %v6421_v10 = vpack.c.bf16 %v6414_v18, %v6414_v18 }
 0x61a   :  { %4930 = vmatmul.msk.bf16.vlgmr.msra.gmra.mxu3 %vm175_vm1, %v6421_v10  ;;  %4931 = vmatmul.msk.bf16.vlgmr.msra.gmra.mxu0 %vm175_vm1, %v6421_v10 }
 0x61b   :  { %4932 = vmatmul.msk.bf16.vlgmr.msra.gmra.mxu1 %vm175_vm1, %v6421_v10  ;;  %4933 = vmatmul.msk.bf16.vlgmr.msrb.gmra.mxu2 %vm175_vm1, %v6421_v10 }
 0x61c   :  { %2385 = vmatpush.bf16.msra.mxu3 %v4901_v24  ;;  %2398 = vmatpush.bf16.msra.mxu0 %v4905_v26  ;;  %v5787_v24 = vld [vmem:[%s6466_s17 + $0x90] sm:$0xff] }
 0x61d   :  { %2411 = vmatpush.bf16.msra.mxu1 %v4909_v29  ;;  %2424 = vmatpush.bf16.msrb.mxu2 %v4913_v30  ;;  %v5771_v26 = vld [vmem:[%s6466_s17 + $0x10] sm:$0xff]  ;;  %v5770_v29 = vld [vmem:[%s6466_s17 + $0x8] sm:$0xff] }
 0x61e   :  { %v5794_v30 = vld [vmem:[%s6466_s17 + $0xc8] sm:$0xff] }
 0x620   :  { %2386 = vmatpush.bf16.msra.mxu3 %v4837_v38  ;;  %2399 = vmatpush.bf16.msra.mxu0 %v4841_v39  ;;  %v5808_v38 = vld [vmem:[%s6466_s17 + $0x138] sm:$0xff] }
 0x621   :  { %2412 = vmatpush.bf16.msra.mxu1 %v4845_v40  ;;  %2425 = vmatpush.bf16.msrb.mxu2 %v4849_v25  ;;  %v5832_v39 = vld [vmem:[%s6466_s17 + $0x1f8] sm:$0xff]  ;;  %v5815_v40 = vld [vmem:[%s6466_s17 + $0x170] sm:$0xff] }
 0x622   :  { %v5823_v25 = vld [vmem:[%s6466_s17 + $0x1b0] sm:$0xff] }
 0x62a   :  { %4934 = vmatmul.msk.bf16.vlgmr.msrb.gmra.mxu3 %vm175_vm1, %v6421_v10  ;;  %4935 = vmatmul.msk.bf16.vlgmr.msrb.gmra.mxu0 %vm175_vm1, %v6421_v10 }
 0x62b   :  { %4936 = vmatmul.msk.bf16.vlgmr.msrb.gmra.mxu1 %vm175_vm1, %v6421_v10  ;;  %4937 = vmatmul.msk.bf16.vlgmr.msra.gmra.mxu2 %vm175_vm1, %v6421_v10 }
 0x62c   :  { %2437 = vmatpush.bf16.msrb.mxu3 %v4917_v23  ;;  %2450 = vmatpush.bf16.msrb.mxu0 %v4921_v33  ;;  %v5805_v23 = vld [vmem:[%s6466_s17 + $0x120] sm:$0xff] }
 0x62d   :  { %2463 = vmatpush.bf16.msrb.mxu1 %v4925_v51  ;;  %2476 = vmatpush.bf16.msra.mxu2 %v4929_v52  ;;  %v5829_v33 = vld [vmem:[%s6466_s17 + $0x1e0] sm:$0xff]  ;;  %v5811_v51 = vld [vmem:[%s6466_s17 + $0x150] sm:$0xff] }
 0x62e   :  { %v5819_v52 = vld [vmem:[%s6466_s17 + $0x190] sm:$0xff] }
 0x630   :  { %2438 = vmatpush.bf16.msrb.mxu3 %v4853_v59  ;;  %2451 = vmatpush.bf16.msrb.mxu0 %v4857_v60  ;;  %v5809_v59 = vld [vmem:[%s6466_s17 + $0x140] sm:$0xff] }
 0x631   :  { %2464 = vmatpush.bf16.msrb.mxu1 %v4861_v61  ;;  %2477 = vmatpush.bf16.msra.mxu2 %v4865_v62  ;;  %v5817_v60 = vld [vmem:[%s6466_s17 + $0x180] sm:$0xff]  ;;  %v5802_v61 = vld [vmem:[%s6466_s17 + $0x108] sm:$0xff] }
 0x632   :  { %v5826_v62 = vld [vmem:[%s6466_s17 + $0x1c8] sm:$0xff] }
 0x63a   :  { %4938 = vmatmul.msk.bf16.vlgmr.msra.gmra.mxu3 %vm175_vm1, %v6421_v10  ;;  %4939 = vmatmul.msk.bf16.vlgmr.msra.gmra.mxu0 %vm175_vm1, %v6421_v10 }
 0x63b   :  { %4940 = vmatmul.msk.bf16.vlgmr.msra.gmra.mxu1 %vm175_vm1, %v6421_v10  ;;  %4941 = vmatmul.msk.bf16.vlgmr.msrb.gmra.mxu2 %vm175_vm1, %v6421_v10 }
 0x63c   :  { %3556 = vmatpush.bf16.msra.mxu0 %v5784_v63  ;;  %3569 = vmatpush.bf16.msra.mxu1 %v5792_v0  ;;  %v5801_v63 = vld [vmem:[%s6466_s17 + $0x100] sm:$0xff] }
 0x63d   :  { %3543 = vmatpush.bf16.msra.mxu3 %v5776_v1  ;;  %3582 = vmatpush.bf16.msrb.mxu2 %v5800_v2  ;;  %v5825_v0 = vld [vmem:[%s6466_s17 + $0x1c0] sm:$0xff] }
 0x63e   :  { %v6554_v1 = vld [vmem:[%s6551_s21] sm:$0xff] }
 0x63f   :  { %v2081_v2 = vperm.slane %v6554_v1, 1 }
 0x640   :  { %3557 = vmatpush.bf16.msra.mxu0 %v5783_v3  ;;  %3570 = vmatpush.bf16.msra.mxu1 %v5791_v4  ;;  %v2082_v3 = vperm.slane %v6554_v1, 2 }
 0x641   :  { %3544 = vmatpush.bf16.msra.mxu3 %v5775_v5  ;;  %3583 = vmatpush.bf16.msrb.mxu2 %v5799_v6 }
 0x644   :  { %3558 = vmatpush.bf16.msra.mxu0 %v5782_v7  ;;  %3571 = vmatpush.bf16.msra.mxu1 %v5790_v8 }
 0x645   :  { %3545 = vmatpush.bf16.msra.mxu3 %v5774_v9  ;;  %3584 = vmatpush.bf16.msrb.mxu2 %v5798_v11  ;;  %v2080_v9 = vperm.slane %v6554_v1, 0 }
 0x648   :  { %3559 = vmatpush.bf16.msra.mxu0 %v5781_v12  ;;  %3572 = vmatpush.bf16.msra.mxu1 %v5789_v13  ;;  %v2083_v12 = vperm.slane %v6554_v1, 3  ;;  %v5848_v13 = vld [vmem:[%s6466_s17 + $0x278] sm:$0xff] }
 0x649   :  { %3546 = vmatpush.bf16.msra.mxu3 %v5773_v14  ;;  %3585 = vmatpush.bf16.msrb.mxu2 %v5797_v15  ;;  %v5856_v15 = vld [vmem:[%s6466_s17 + $0x2b8] sm:$0xff] }
 0x64a   :  { %4942 = vmatmul.msk.bf16.vlgmr.msrb.gmra.mxu3 %vm175_vm1, %v6421_v10  ;;  %4943 = vmatmul.msk.bf16.vlgmr.msrb.gmra.mxu0 %vm175_vm1, %v6421_v10 }
 0x64b   :  { %4944 = vmatmul.msk.bf16.vlgmr.msrb.gmra.mxu1 %vm175_vm1, %v6421_v10  ;;  %4945 = vmatmul.msk.bf16.vlgmr.msra.gmra.mxu2 %vm175_vm1, %v6421_v10  ;;  %v5786_v10 = vld [vmem:[%s6466_s17 + $0x88] sm:$0xff] }
 0x64c   :  { %3560 = vmatpush.bf16.msra.mxu0 %v5780_v16  ;;  %3573 = vmatpush.bf16.msra.mxu1 %v5788_v17 }
 0x64d   :  { %3547 = vmatpush.bf16.msra.mxu3 %v5772_v19  ;;  %3586 = vmatpush.bf16.msrb.mxu2 %v5796_v20 }
 0x650   :  { %3561 = vmatpush.bf16.msra.mxu0 %v5779_v21  ;;  %3574 = vmatpush.bf16.msra.mxu1 %v5787_v24 }
 0x651   :  { %3548 = vmatpush.bf16.msra.mxu3 %v5771_v26  ;;  %3587 = vmatpush.bf16.msrb.mxu2 %v5795_v27  ;;  %v5847_v26 = vld [vmem:[%s6466_s17 + $0x270] sm:$0xff] }
 0x654   :  { %3562 = vmatpush.bf16.msra.mxu0 %v5778_v28  ;;  %3575 = vmatpush.bf16.msra.mxu1 %v5786_v10  ;;  %v5855_v10 = vld [vmem:[%s6466_s17 + $0x2b0] sm:$0xff] }
 0x655   :  { %3549 = vmatpush.bf16.msra.mxu3 %v5770_v29  ;;  %3588 = vmatpush.bf16.msrb.mxu2 %v5794_v30  ;;  %v5840_v30 = vld [vmem:[%s6466_s17 + $0x238] sm:$0xff] }
 0x658   :  { %3563 = vmatpush.bf16.msra.mxu0 %v5777_v31  ;;  %3576 = vmatpush.bf16.msra.mxu1 %v5785_v32  ;;  %v5864_v32 = vld [vmem:[%s6466_s17 + $0x2f8] sm:$0xff] }
 0x659   :  { %3550 = vmatpush.bf16.msra.mxu3 %v5769_v36  ;;  %3589 = vmatpush.bf16.msrb.mxu2 %v5793_v37  ;;  %v5854_v36 = vld [vmem:[%s6466_s17 + $0x2a8] sm:$0xff]  ;;  %v2085_v37 = vperm.slane %v6554_v1, 5 }
 0x65c   :  { %3608 = vmatpush.bf16.msrb.mxu0 %v5816_v34  ;;  %3621 = vmatpush.bf16.msrb.mxu1 %v5824_v35  ;;  %v5846_v35 = vld [vmem:[%s6466_s17 + $0x268] sm:$0xff] }
 0x65d   :  { %3595 = vmatpush.bf16.msrb.mxu3 %v5808_v38  ;;  %3634 = vmatpush.bf16.msra.mxu2 %v5832_v39  ;;  %v2086_v39 = vperm.slane %v6554_v1, 6 }
 0x660   :  { %3609 = vmatpush.bf16.msrb.mxu0 %v5815_v40  ;;  %3622 = vmatpush.bf16.msrb.mxu1 %v5823_v25  ;;  %v5839_v40 = vld [vmem:[%s6466_s17 + $0x230] sm:$0xff] }
 0x661   :  { %3596 = vmatpush.bf16.msrb.mxu3 %v5807_v41  ;;  %3635 = vmatpush.bf16.msra.mxu2 %v5831_v42  ;;  %v5863_v41 = vld [vmem:[%s6466_s17 + $0x2f0] sm:$0xff] }
 0x664   :  { %3610 = vmatpush.bf16.msrb.mxu0 %v5814_v43  ;;  %3623 = vmatpush.bf16.msrb.mxu1 %v5822_v44  ;;  %v5845_v43 = vld [vmem:[%s6466_s17 + $0x260] sm:$0xff] }
 0x665   :  { %3597 = vmatpush.bf16.msrb.mxu3 %v5806_v45  ;;  %3636 = vmatpush.bf16.msra.mxu2 %v5830_v46  ;;  %v5853_v46 = vld [vmem:[%s6466_s17 + $0x2a0] sm:$0xff] }
 0x668   :  { %3611 = vmatpush.bf16.msrb.mxu0 %v5813_v47  ;;  %3624 = vmatpush.bf16.msrb.mxu1 %v5821_v48  ;;  %v5838_v48 = vld [vmem:[%s6466_s17 + $0x228] sm:$0xff] }
 0x669   :  { %3598 = vmatpush.bf16.msrb.mxu3 %v5805_v23  ;;  %3637 = vmatpush.bf16.msra.mxu2 %v5829_v33  ;;  %v5862_v33 = vld [vmem:[%s6466_s17 + $0x2e8] sm:$0xff] }
 0x66c   :  { %3612 = vmatpush.bf16.msrb.mxu0 %v5812_v49  ;;  %3625 = vmatpush.bf16.msrb.mxu1 %v5820_v50  ;;  %v2084_v49 = vperm.slane %v6554_v1, 4 }
 0x66d   :  { %3599 = vmatpush.bf16.msrb.mxu3 %v5804_v53  ;;  %3638 = vmatpush.bf16.msra.mxu2 %v5828_v54  ;;  %v5852_v54 = vld [vmem:[%s6466_s17 + $0x298] sm:$0xff] }
 0x670   :  { %3613 = vmatpush.bf16.msrb.mxu0 %v5811_v51  ;;  %3626 = vmatpush.bf16.msrb.mxu1 %v5819_v52  ;;  %v2087_v51 = vperm.slane %v6554_v1, 7  ;;  %v5844_v52 = vld [vmem:[%s6466_s17 + $0x258] sm:$0xff] }
 0x671   :  { %3600 = vmatpush.bf16.msrb.mxu3 %v5803_v57  ;;  %3639 = vmatpush.bf16.msra.mxu2 %v5827_v58  ;;  %v5837_v57 = vld [vmem:[%s6466_s17 + $0x220] sm:$0xff] }
 0x674   :  { %3614 = vmatpush.bf16.msrb.mxu0 %v5810_v55  ;;  %3627 = vmatpush.bf16.msrb.mxu1 %v5818_v56 }
 0x675   :  { %3601 = vmatpush.bf16.msrb.mxu3 %v5802_v61  ;;  %3640 = vmatpush.bf16.msra.mxu2 %v5826_v62 }
 0x678   :  { %3615 = vmatpush.bf16.msrb.mxu0 %v5809_v59  ;;  %3628 = vmatpush.bf16.msrb.mxu1 %v5817_v60  ;;  %v5861_v60 = vld [vmem:[%s6466_s17 + $0x2e0] sm:$0xff] }
 0x679   :  { %3602 = vmatpush.bf16.msrb.mxu3 %v5801_v63  ;;  %3641 = vmatpush.bf16.msra.mxu2 %v5825_v0  ;;  %v5843_v63 = vld [vmem:[%s6466_s17 + $0x250] sm:$0xff] }
 0x697   :  { %v2297_v4 = vpop.f32.mrf.mxu0 }
 0x698   :  { %v2298_v5 = vadd.f32 %v2297_v4, %v2081_v2  ;;  %v2310_v6 = vpop.f32.mrf.mxu1  ;;  %v5851_v2 = vld [vmem:[%s6466_s17 + $0x290] sm:$0xff]  ;;  %v5836_v4 = vld [vmem:[%s6466_s17 + $0x218] sm:$0xff] }
 0x699   :  { %v2311_v7 = vadd.f32 %v2310_v6, %v2082_v3 }
 0x69a   :  { %v2484_v8 = vmax.f32 %v2298_v5, 0.0  ;;  %v6591_v5 = vld [vmem:[%s6551_s21 + $0x8] sm:$0xff] }
 0x69b   :  { %v2485_v11 = vmax.f32 %v2311_v7, 0.0  ;;  %v5860_v7 = vld [vmem:[%s6466_s17 + $0x2d8] sm:$0xff] }
 0x69c   :  { %v2500_v14 = vpack.c.bf16 %v2484_v8, %v2484_v8 }
 0x69d   :  { %v2501_v16 = vpack.c.bf16 %v2485_v11, %v2485_v11  ;;  %v2284_v17 = vpop.f32.mrf.mxu3  ;;  %v5850_v11 = vld [vmem:[%s6466_s17 + $0x288] sm:$0xff] }
 0x69e   :  { %v2285_v19 = vadd.f32 %v2284_v17, %v2080_v9  ;;  %v2323_v20 = vpop.f32.mrf.mxu2  ;;  %3564 = vmatmul.bf16.vlgmr.msra.gmra.mxu0 %v2500_v14  ;;  %v5842_v9 = vld [vmem:[%s6466_s17 + $0x248] sm:$0xff]  ;;  %v2090_v14 = vperm.slane %v6591_v5, 2  ;;  %v5859_v17 = vld [vmem:[%s6466_s17 + $0x2d0] sm:$0xff] }
 0x69f   :  { %v2324_v21 = vadd.f32 %v2323_v20, %v2083_v12  ;;  %3577 = vmatmul.bf16.vlgmr.msra.gmra.mxu1 %v2501_v16  ;;  %3660 = vmatpush.bf16.msra.mxu0 %v5848_v13  ;;  %v2299_v24 = vpop.f32.mrf.mxu0  ;;  %v2089_v12 = vperm.slane %v6591_v5, 1  ;;  %v5841_v20 = vld [vmem:[%s6466_s17 + $0x240] sm:$0xff] }
 0x6a0   :  { %v2483_v27 = vmax.f32 %v2285_v19, 0.0  ;;  %3673 = vmatpush.bf16.msra.mxu1 %v5856_v15  ;;  %v2312_v28 = vpop.f32.mrf.mxu1  ;;  %v5835_v15 = vld [vmem:[%s6466_s17 + $0x210] sm:$0xff] }
 0x6a1   :  { %v2486_v29 = vmax.f32 %v2324_v21, 0.0 }
 0x6a2   :  { %v2499_v31 = vpack.c.bf16 %v2483_v27, %v2483_v27  ;;  %v5880_v27 = vld [vmem:[%s6466_s17 + $0x378] sm:$0xff] }
 0x6a3   :  { %v2502_v34 = vpack.c.bf16 %v2486_v29, %v2486_v29  ;;  %3661 = vmatpush.bf16.msra.mxu0 %v5847_v26  ;;  %v5849_v26 = vld [vmem:[%s6466_s17 + $0x280] sm:$0xff]  ;;  %v5834_v29 = vld [vmem:[%s6466_s17 + $0x208] sm:$0xff] }
 0x6a4   :  { %3674 = vmatpush.bf16.msra.mxu1 %v5855_v10  ;;  %3551 = vmatmul.bf16.vlgmr.msra.gmra.mxu3 %v2499_v31  ;;  %v5888_v10 = vld [vmem:[%s6466_s17 + $0x3b8] sm:$0xff]  ;;  %v5858_v31 = vld [vmem:[%s6466_s17 + $0x2c8] sm:$0xff] }
 0x6a5   :  { %3590 = vmatmul.bf16.vlgmr.msrb.gmra.mxu2 %v2502_v34  ;;  %3647 = vmatpush.bf16.msra.mxu3 %v5840_v30  ;;  %v2286_v38 = vpop.f32.mrf.mxu3 }
 0x6a6   :  { %3686 = vmatpush.bf16.msrb.mxu2 %v5864_v32  ;;  %v2325_v25 = vpop.f32.mrf.mxu2  ;;  %v2088_v32 = vperm.slane %v6591_v5, 0 }
 0x6a7   :  { %3662 = vmatpush.bf16.msra.mxu0 %v5846_v35  ;;  %v2349_v42 = vpop.f32.mrf.mxu0  ;;  %v2091_v35 = vperm.slane %v6591_v5, 3  ;;  %v5833_v25 = vld [vmem:[%s6466_s17 + $0x200] sm:$0xff] }
 0x6a8   :  { %3675 = vmatpush.bf16.msra.mxu1 %v5854_v36  ;;  %v2350_v44 = vadd.f32 %v2349_v42, %v2085_v37  ;;  %v2362_v45 = vpop.f32.mrf.mxu1  ;;  %v5879_v37 = vld [vmem:[%s6466_s17 + $0x370] sm:$0xff] }
 0x6a9   :  { %v2363_v47 = vadd.f32 %v2362_v45, %v2086_v39  ;;  %3648 = vmatpush.bf16.msra.mxu3 %v5839_v40  ;;  %v5887_v40 = vld [vmem:[%s6466_s17 + $0x3b0] sm:$0xff] }
 0x6aa   :  { %v2488_v23 = vmax.f32 %v2350_v44, 0.0  ;;  %3687 = vmatpush.bf16.msrb.mxu2 %v5863_v41  ;;  %v5872_v44 = vld [vmem:[%s6466_s17 + $0x338] sm:$0xff] }
 0x6ab   :  { %v2489_v50 = vmax.f32 %v2363_v47, 0.0  ;;  %3663 = vmatpush.bf16.msra.mxu0 %v5845_v43  ;;  %v5857_v43 = vld [vmem:[%s6466_s17 + $0x2c0] sm:$0xff]  ;;  %v5896_v47 = vld [vmem:[%s6466_s17 + $0x3f8] sm:$0xff] }
 0x6ac   :  { %v2504_v53 = vpack.c.bf16 %v2488_v23, %v2488_v23  ;;  %3676 = vmatpush.bf16.msra.mxu1 %v5853_v46 }
 0x6ad   :  { %v2505_v55 = vpack.c.bf16 %v2489_v50, %v2489_v50  ;;  %3649 = vmatpush.bf16.msra.mxu3 %v5838_v48  ;;  %v2336_v56 = vpop.f32.mrf.mxu3  ;;  %v5886_v50 = vld [vmem:[%s6466_s17 + $0x3a8] sm:$0xff] }
 0x6ae   :  { %3688 = vmatpush.bf16.msrb.mxu2 %v5862_v33  ;;  %v2337_v58 = vadd.f32 %v2336_v56, %v2084_v49  ;;  %v2375_v59 = vpop.f32.mrf.mxu2  ;;  %3616 = vmatmul.bf16.vlgmr.msrb.gmra.mxu0 %v2504_v53  ;;  %v5878_v33 = vld [vmem:[%s6466_s17 + $0x368] sm:$0xff] }
 0x6af   :  { %v2376_v61 = vadd.f32 %v2375_v59, %v2087_v51  ;;  %3629 = vmatmul.bf16.vlgmr.msrb.gmra.mxu1 %v2505_v55  ;;  %3664 = vmatpush.bf16.msra.mxu0 %v5844_v52  ;;  %v2351_v62 = vpop.f32.mrf.mxu0  ;;  %v5871_v52 = vld [vmem:[%s6466_s17 + $0x330] sm:$0xff]  ;;  %v5877_v55 = vld [vmem:[%s6466_s17 + $0x360] sm:$0xff]  ;;  %v5870_v59 = vld [vmem:[%s6466_s17 + $0x328] sm:$0xff] }
 0x6b0   :  { %v2487_v0 = vmax.f32 %v2337_v58, 0.0  ;;  %3677 = vmatpush.bf16.msra.mxu1 %v5852_v54  ;;  %v2364_v1 = vpop.f32.mrf.mxu1  ;;  %v5895_v54 = vld [vmem:[%s6466_s17 + $0x3f0] sm:$0xff] }
 0x6b1   :  { %v2490_v3 = vmax.f32 %v2376_v61, 0.0  ;;  %3650 = vmatpush.bf16.msra.mxu3 %v5837_v57  ;;  %v5885_v57 = vld [vmem:[%s6466_s17 + $0x3a0] sm:$0xff]  ;;  %v5894_v61 = vld [vmem:[%s6466_s17 + $0x3e8] sm:$0xff] }
 0x6b2   :  { %v2503_v6 = vpack.c.bf16 %v2487_v0, %v2487_v0  ;;  %3689 = vmatpush.bf16.msrb.mxu2 %v5861_v60  ;;  %v5884_v0 = vld [vmem:[%s6466_s17 + $0x398] sm:$0xff]  ;;  %v5869_v1 = vld [vmem:[%s6466_s17 + $0x320] sm:$0xff] }
 0x6b3   :  { %v2506_v8 = vpack.c.bf16 %v2490_v3, %v2490_v3  ;;  %3665 = vmatpush.bf16.msra.mxu0 %v5843_v63  ;;  %v5876_v63 = vld [vmem:[%s6466_s17 + $0x358] sm:$0xff]  ;;  %v5875_v3 = vld [vmem:[%s6466_s17 + $0x350] sm:$0xff] }
 0x6b4   :  { %3678 = vmatpush.bf16.msra.mxu1 %v5851_v2  ;;  %3603 = vmatmul.bf16.vlgmr.msrb.gmra.mxu3 %v2503_v6  ;;  %v5893_v2 = vld [vmem:[%s6466_s17 + $0x3e0] sm:$0xff] }
 0x6b5   :  { %3642 = vmatmul.bf16.vlgmr.msra.gmra.mxu2 %v2506_v8  ;;  %3651 = vmatpush.bf16.msra.mxu3 %v5836_v4  ;;  %v2338_v13 = vpop.f32.mrf.mxu3  ;;  %v2093_v4 = vperm.slane %v6591_v5, 5  ;;  %v2094_v8 = vperm.slane %v6591_v5, 6 }
 0x6b6   :  { %3690 = vmatpush.bf16.msrb.mxu2 %v5860_v7  ;;  %v2377_v16 = vpop.f32.mrf.mxu2  ;;  %v5883_v7 = vld [vmem:[%s6466_s17 + $0x390] sm:$0xff]  ;;  %v5892_v13 = vld [vmem:[%s6466_s17 + $0x3d8] sm:$0xff] }
 0x6b7   :  { %3666 = vmatpush.bf16.msra.mxu0 %v5842_v9  ;;  %v2401_v19 = vpop.f32.mrf.mxu0 }
 0x6b8   :  { %3679 = vmatpush.bf16.msra.mxu1 %v5850_v11  ;;  %v2402_v21 = vadd.f32 %v2401_v19, %v2089_v12  ;;  %v2414_v24 = vpop.f32.mrf.mxu1  ;;  %v5868_v11 = vld [vmem:[%s6466_s17 + $0x318] sm:$0xff] }
 0x6b9   :  { %v2415_v28 = vadd.f32 %v2414_v24, %v2090_v14  ;;  %3652 = vmatpush.bf16.msra.mxu3 %v5835_v15  ;;  %v5874_v15 = vld [vmem:[%s6466_s17 + $0x348] sm:$0xff]  ;;  %v5891_v24 = vld [vmem:[%s6466_s17 + $0x3d0] sm:$0xff] }
 0x6ba   :  { %v2492_v30 = vmax.f32 %v2402_v21, 0.0  ;;  %3691 = vmatpush.bf16.msrb.mxu2 %v5859_v17  ;;  %v5882_v17 = vld [vmem:[%s6466_s17 + $0x388] sm:$0xff]  ;;  %v2092_v21 = vperm.slane %v6591_v5, 4 }
 0x6bb   :  { %v2493_v34 = vmax.f32 %v2415_v28, 0.0  ;;  %3667 = vmatpush.bf16.msra.mxu0 %v5841_v20  ;;  %v5867_v20 = vld [vmem:[%s6466_s17 + $0x310] sm:$0xff] }
 0x6bc   :  { %v2508_v36 = vpack.c.bf16 %v2492_v30, %v2492_v30  ;;  %3680 = vmatpush.bf16.msra.mxu1 %v5849_v26  ;;  %v2095_v26 = vperm.slane %v6591_v5, 7 }
 0x6bd   :  { %v2509_v38 = vpack.c.bf16 %v2493_v34, %v2493_v34  ;;  %3653 = vmatpush.bf16.msra.mxu3 %v5834_v29  ;;  %v2388_v39 = vpop.f32.mrf.mxu3  ;;  %v5881_v29 = vld [vmem:[%s6466_s17 + $0x380] sm:$0xff] }
 0x6be   :  { %3692 = vmatpush.bf16.msrb.mxu2 %v5858_v31  ;;  %v2389_v41 = vadd.f32 %v2388_v39, %v2088_v32  ;;  %v2427_v42 = vpop.f32.mrf.mxu2  ;;  %3668 = vmatmul.bf16.vlgmr.msra.gmra.mxu0 %v2508_v36  ;;  %v5866_v32 = vld [vmem:[%s6466_s17 + $0x308] sm:$0xff] }
 0x6bf   :  { %3712 = vmatpush.bf16.msrb.mxu0 %v5880_v27  ;;  %v2428_v45 = vadd.f32 %v2427_v42, %v2091_v35  ;;  %3681 = vmatmul.bf16.vlgmr.msra.gmra.mxu1 %v2509_v38  ;;  %v2403_v46 = vpop.f32.mrf.mxu0  ;;  %v5873_v27 = vld [vmem:[%s6466_s17 + $0x340] sm:$0xff]  ;;  %v5890_v35 = vld [vmem:[%s6466_s17 + $0x3c8] sm:$0xff] }
 0x6c0   :  { %3725 = vmatpush.bf16.msrb.mxu1 %v5888_v10  ;;  %v2491_v48 = vmax.f32 %v2389_v41, 0.0  ;;  %v2416_v23 = vpop.f32.mrf.mxu1  ;;  %v5865_v38 = vld [vmem:[%s6466_s17 + $0x300] sm:$0xff] }
 0x6c1   :  { %v2494_v49 = vmax.f32 %v2428_v45, 0.0  ;;  %3654 = vmatpush.bf16.msra.mxu3 %v5833_v25 }
 0x6c2   :  { %v2507_v51 = vpack.c.bf16 %v2491_v48, %v2491_v48  ;;  %3693 = vmatpush.bf16.msrb.mxu2 %v5857_v43 }
 0x6c3   :  { %3713 = vmatpush.bf16.msrb.mxu0 %v5879_v37  ;;  %v2510_v53 = vpack.c.bf16 %v2494_v49, %v2494_v49 }
 0x6c4   :  { %3726 = vmatpush.bf16.msrb.mxu1 %v5887_v40  ;;  %3655 = vmatmul.bf16.vlgmr.msra.gmra.mxu3 %v2507_v51  ;;  %v5889_v40 = vld [vmem:[%s6466_s17 + $0x3c0] sm:$0xff] }
 0x6c5   :  { %3699 = vmatpush.bf16.msrb.mxu3 %v5872_v44  ;;  %3694 = vmatmul.bf16.vlgmr.msrb.gmra.mxu2 %v2510_v53  ;;  %v2390_v56 = vpop.f32.mrf.mxu3  ;;  %v5965_v53 = vld [vmem:[%s6569_s25] ss:$0 sm:$0xff] }
 0x6c6   :  { %3738 = vmatpush.bf16.msra.mxu2 %v5896_v47  ;;  %v2429_v58 = vpop.f32.mrf.mxu2 }
 0x6c7   :  { %3714 = vmatpush.bf16.msrb.mxu0 %v5878_v33  ;;  %v2453_v60 = vpop.f32.mrf.mxu0 }
 0x6c8   :  { %3727 = vmatpush.bf16.msrb.mxu1 %v5886_v50  ;;  %v2466_v62 = vpop.f32.mrf.mxu1  ;;  %v2454_v16 = vadd.f32 %v2453_v60, %v2093_v4 }
 0x6c9   :  { %3700 = vmatpush.bf16.msrb.mxu3 %v5871_v52  ;;  %v2467_v19 = vadd.f32 %v2466_v62, %v2094_v8 }
 0x6ca   :  { %3739 = vmatpush.bf16.msra.mxu2 %v5895_v54  ;;  %v2496_v28 = vmax.f32 %v2454_v16, 0.0 }
 0x6cb   :  { %3715 = vmatpush.bf16.msrb.mxu0 %v5877_v55  ;;  %v2497_v30 = vmax.f32 %v2467_v19, 0.0 }
 0x6cc   :  { %3728 = vmatpush.bf16.msrb.mxu1 %v5885_v57  ;;  %v2512_v37 = vpack.c.bf16 %v2496_v28, %v2496_v28 }
 0x6cd   :  { %3701 = vmatpush.bf16.msrb.mxu3 %v5870_v59  ;;  %v2440_v6 = vpop.f32.mrf.mxu3  ;;  %v2513_v5 = vpack.c.bf16 %v2497_v30, %v2497_v30 }
 0x6ce   :  { %3740 = vmatpush.bf16.msra.mxu2 %v5894_v61  ;;  %v2479_v9 = vpop.f32.mrf.mxu2  ;;  %v2441_v34 = vadd.f32 %v2440_v6, %v2092_v21 }
 0x6cf   :  { %3716 = vmatpush.bf16.msrb.mxu0 %v5876_v63  ;;  %v2455_v12 = vpop.f32.mrf.mxu0  ;;  %v2480_v36 = vadd.f32 %v2479_v9, %v2095_v26 }
 0x6d0   :  { %3729 = vmatpush.bf16.msrb.mxu1 %v5884_v0  ;;  %v2468_v14 = vpop.f32.mrf.mxu1  ;;  %v2495_v39 = vmax.f32 %v2441_v34, 0.0 }
 0x6d1   :  { %3702 = vmatpush.bf16.msrb.mxu3 %v5869_v1  ;;  %v2498_v25 = vmax.f32 %v2480_v36, 0.0 }
 0x6d2   :  { %3741 = vmatpush.bf16.msra.mxu2 %v5893_v2  ;;  %v2511_v41 = vpack.c.bf16 %v2495_v39, %v2495_v39  ;;  %v5899_v39 = vld [vmem:[%s4116_s7 + $0x14] sm:$0xf] }
 0x6d3   :  { %3717 = vmatpush.bf16.msrb.mxu0 %v5875_v3  ;;  %v2514_v42 = vpack.c.bf16 %v2498_v25, %v2498_v25  ;;  %v5470_v25 = vld [vmem:[%s4116_s7 + $0x18] sm:$0xf0] }
 0x6d4   :  { %3730 = vmatpush.bf16.msrb.mxu1 %v5883_v7 }
 0x6d5   :  { %3703 = vmatpush.bf16.msrb.mxu3 %v5868_v11  ;;  %v2442_v10 = vpop.f32.mrf.mxu3 }
 0x6d6   :  { %3742 = vmatpush.bf16.msra.mxu2 %v5892_v13  ;;  %v2481_v31 = vpop.f32.mrf.mxu2 }
 0x6d7   :  { %3718 = vmatpush.bf16.msrb.mxu0 %v5874_v15 }
 0x6d8   :  { %3731 = vmatpush.bf16.msrb.mxu1 %v5882_v17 }
 0x6d9   :  { %3704 = vmatpush.bf16.msrb.mxu3 %v5867_v20 }
 0x6da   :  { %3743 = vmatpush.bf16.msra.mxu2 %v5891_v24 }
 0x6db   :  { %3719 = vmatpush.bf16.msrb.mxu0 %v5873_v27 }
 0x6dc   :  { %3732 = vmatpush.bf16.msrb.mxu1 %v5881_v29 }
 0x6dd   :  { %3705 = vmatpush.bf16.msrb.mxu3 %v5866_v32 }
 0x6de   :  { %3744 = vmatpush.bf16.msra.mxu2 %v5890_v35  ;;  %3720 = vmatmul.bf16.vlgmr.msrb.gmra.mxu0 %v2512_v37 }
 0x6df   :  { %3733 = vmatmul.bf16.vlgmr.msrb.gmra.mxu1 %v2513_v5 }
 0x6e1   :  { %3706 = vmatpush.bf16.msrb.mxu3 %v5865_v38  ;;  %v5900_v38 = vld [vmem:[%s4116_s7 + $0x14] sm:$0xf0] }
 0x6e2   :  { %3745 = vmatpush.bf16.msra.mxu2 %v5889_v40 }
 0x6e4   :  { %3707 = vmatmul.bf16.vlgmr.msrb.gmra.mxu3 %v2511_v41  ;;  %v5473_v41 = vor.u32 %v5899_v39, %v5470_v25 }
 0x6e5   :  { %3746 = vmatmul.bf16.vlgmr.msra.gmra.mxu2 %v2514_v42  ;;  %v5460_v42 = vld [vmem:[%s4116_s7] sm:$0xf] }
 0x6e6   :  { %3837 = vmatpush.bf16.msra.mxu0 %v5473_v41 }
 0x71b   :  { %v3565_v43 = vpop.f32.mrf.mxu0 }
 0x71c   :  { %v3578_v44 = vpop.f32.mrf.mxu1 }
 0x723   :  { %v3567_v45 = vpop.f32.mrf.mxu0 }
 0x724   :  { %v3580_v46 = vpop.f32.mrf.mxu1 }
 0x725   :  { %v5462_v46 = vld [vmem:[%s4116_s7 + $0x8] sm:$0xf0] }
 0x727   :  { %v3552_v47 = vpop.f32.mrf.mxu3 }
 0x728   :  { %v3591_v48 = vpop.f32.mrf.mxu2  ;;  %v3553_v56 = vadd.f32 %v5965_v53, %v3552_v47  ;;  %v5914_v53 = vld [vmem:[%s6665_s11 + $0x68] sm:$0xff] }
 0x72a   :  { %v3566_v59 = vadd.f32 %v3565_v43, %v3553_v56  ;;  %v5898_v43 = vld [vmem:[%s4116_s7 + $0x4] sm:$0xf0]  ;;  %v5905_v56 = vld [vmem:[%s6665_s11 + $0x20] sm:$0xff] }
 0x72b   :  { %v3617_v23 = vpop.f32.mrf.mxu0  ;;  %v5461_v45 = vor.u32 %v5898_v43, %v5460_v42 }
 0x72c   :  { %v3630_v33 = vpop.f32.mrf.mxu1  ;;  %v3579_v62 = vadd.f32 %v3578_v44, %v3566_v59  ;;  %v5897_v44 = vld [vmem:[%s4116_s7 + $0x4] sm:$0xf]  ;;  %v5904_v59 = vld [vmem:[%s6665_s11 + $0x18] sm:$0xff] }
 0x72d   :  { %v5465_v47 = vor.u32 %v5897_v44, %v5462_v46  ;;  %v5969_v46 = vld [vmem:[%s4121_s27] ss:$0 sm:$0xff] }
 0x72e   :  { %v3592_v1 = vadd.f32 %v3591_v48, %v3579_v62  ;;  %v5916_v48 = vld [vmem:[%s6665_s11 + $0x78] sm:$0xff]  ;;  %v5911_v62 = vld [vmem:[%s6665_s11 + $0x50] sm:$0xff] }
 0x72f   :  { %v3554_v49 = vpop.f32.mrf.mxu3  ;;  %3838 = vmatpush.bf16.msra.mxu0 %v5465_v47  ;;  %3993 = vmatpush.bf16.msrb.mxu2 %v5916_v48 }
 0x730   :  { %v3593_v50 = vpop.f32.mrf.mxu2 }
 0x731   :  { %v5915_v50 = vld [vmem:[%s6665_s11 + $0x70] sm:$0xff] }
 0x733   :  { %v3619_v51 = vpop.f32.mrf.mxu0  ;;  %3994 = vmatpush.bf16.msrb.mxu2 %v5915_v50 }
 0x734   :  { %v3632_v52 = vpop.f32.mrf.mxu1  ;;  %v5907_v51 = vld [vmem:[%s6665_s11 + $0x30] sm:$0xff] }
 0x737   :  { %v3604_v54 = vpop.f32.mrf.mxu3  ;;  %3995 = vmatpush.bf16.msrb.mxu2 %v5914_v53 }
 0x738   :  { %v3643_v55 = vpop.f32.mrf.mxu2  ;;  %v3605_v4 = vadd.f32 %v3604_v54, %v3592_v1  ;;  %v5906_v54 = vld [vmem:[%s6665_s11 + $0x28] sm:$0xff]  ;;  %v5966_v1 = vld [vmem:[%s6648_s29] ss:$0 sm:$0xff] }
 0x73a   :  { %v3618_v6 = vadd.f32 %v3617_v23, %v3605_v4  ;;  %v5908_v23 = vld [vmem:[%s6665_s11 + $0x38] sm:$0xff] }
 0x73b   :  { %v3669_v57 = vpop.f32.mrf.mxu0  ;;  %3980 = vmatpush.bf16.msra.mxu1 %v5908_v23 }
 0x73c   :  { %v3682_v58 = vpop.f32.mrf.mxu1  ;;  %v3631_v9 = vadd.f32 %v3630_v33, %v3618_v6 }
 0x73e   :  { %v3644_v11 = vadd.f32 %v3643_v55, %v3631_v9  ;;  %v5913_v55 = vld [vmem:[%s6665_s11 + $0x60] sm:$0xff]  ;;  %v5910_v9 = vld [vmem:[%s6665_s11 + $0x48] sm:$0xff] }
 0x73f   :  { %v3606_v60 = vpop.f32.mrf.mxu3  ;;  %3981 = vmatpush.bf16.msra.mxu1 %v5907_v51  ;;  %3996 = vmatpush.bf16.msrb.mxu2 %v5913_v55 }
 0x740   :  { %v3645_v61 = vpop.f32.mrf.mxu2 }
 0x743   :  { %v3671_v63 = vpop.f32.mrf.mxu0  ;;  %3982 = vmatpush.bf16.msra.mxu1 %v5906_v54 }
 0x744   :  { %v3684_v0 = vpop.f32.mrf.mxu1 }
 0x747   :  { %v3656_v2 = vpop.f32.mrf.mxu3  ;;  %3983 = vmatpush.bf16.msra.mxu1 %v5905_v56 }
 0x748   :  { %v3695_v3 = vpop.f32.mrf.mxu2  ;;  %v3657_v12 = vadd.f32 %v3656_v2, %v3644_v11  ;;  %v5903_v11 = vld [vmem:[%s6665_s11 + $0x10] sm:$0xff] }
 0x74a   :  { %v3670_v15 = vadd.f32 %v3669_v57, %v3657_v12  ;;  %v5909_v12 = vld [vmem:[%s6665_s11 + $0x40] sm:$0xff] }
 0x74b   :  { %3984 = vmatpush.bf16.msra.mxu1 %v5904_v59 }
 0x74c   :  { %v3683_v16 = vadd.f32 %v3682_v58, %v3670_v15  ;;  %v5912_v58 = vld [vmem:[%s6665_s11 + $0x58] sm:$0xff] }
 0x74d   :  { %3997 = vmatpush.bf16.msrb.mxu2 %v5912_v58  ;;  %v5924_v15 = vld [vmem:[%s6695_s19 + $0x38] sm:$0xff] }
 0x74e   :  { %v3696_v20 = vadd.f32 %v3695_v3, %v3683_v16  ;;  %v5967_v3 = vld [vmem:[%s6654_s3] ss:$0 sm:$0xff]  ;;  %v5923_v16 = vld [vmem:[%s6695_s19 + $0x30] sm:$0xff] }
 0x74f   :  { %v3658_v7 = vpop.f32.mrf.mxu3  ;;  %3985 = vmatpush.bf16.msra.mxu1 %v5903_v11 }
 0x750   :  { %v3697_v8 = vpop.f32.mrf.mxu2 }
 0x751   :  { %3998 = vmatpush.bf16.msrb.mxu2 %v5911_v62 }
 0x755   :  { %3999 = vmatpush.bf16.msrb.mxu2 %v5910_v9 }
 0x759   :  { %4000 = vmatpush.bf16.msrb.mxu2 %v5909_v12 }
 0x75b   :  { %v3721_v13 = vpop.f32.mrf.mxu0 }
 0x75c   :  { %v3734_v14 = vpop.f32.mrf.mxu1 }
 0x763   :  { %v3723_v17 = vpop.f32.mrf.mxu0 }
 0x764   :  { %v3736_v19 = vpop.f32.mrf.mxu1  ;;  %v5922_v17 = vld [vmem:[%s6695_s19 + $0x28] sm:$0xff] }
 0x765   :  { %v5921_v19 = vld [vmem:[%s6695_s19 + $0x20] sm:$0xff] }
 0x767   :  { %v3708_v21 = vpop.f32.mrf.mxu3 }
 0x768   :  { %v3709_v24 = vadd.f32 %v3708_v21, %v3696_v20  ;;  %v3747_v26 = vpop.f32.mrf.mxu2  ;;  %v3789_v20 = vld [vmem:[%s4117_s23] sm:$0x3]  ;;  %v5920_v21 = vld [vmem:[%s6695_s19 + $0x18] sm:$0xff] }
 0x76a   :  { %v3722_v27 = vadd.f32 %v3721_v13, %v3709_v24  ;;  %v5902_v13 = vld [vmem:[%s6665_s11 + $0x8] sm:$0xff]  ;;  %v3792_v24 = vperm.slane %v3789_v20, 1 }
 0x76b   :  { %3986 = vmatpush.bf16.msra.mxu1 %v5902_v13 }
 0x76c   :  { %v3735_v28 = vadd.f32 %v3734_v14, %v3722_v27  ;;  %v5901_v14 = vld [vmem:[%s6665_s11] sm:$0xff]  ;;  %v5919_v27 = vld [vmem:[%s6695_s19 + $0x10] sm:$0xff] }
 0x76e   :  { %v3748_v10 = vadd.f32 %v3747_v26, %v3735_v28 }
 0x76f   :  { %v3710_v29 = vpop.f32.mrf.mxu3  ;;  %3987 = vmatpush.bf16.msra.mxu1 %v5901_v14 }
 0x770   :  { %v3749_v30 = vpop.f32.mrf.mxu2  ;;  %v3751_v31 = vadd.f32 %v3748_v10, %v6414_v18  ;;  %v5468_v18 = vld [vmem:[%s4116_s7 + $0x10] sm:$0xf]  ;;  %v3791_v29 = vperm.slane %v3789_v20, 0 }
 0x771   :  { %v5469_v40 = vor.u32 %v5900_v38, %v5468_v18  ;;  %v5917_v18 = vld [vmem:[%s6695_s19] sm:$0xff] }
 0x772   :  { %v3752_v32 = vsel %vm175_vm1, %v3751_v31, 0.0  ;;  %v5968_v38 = vld [vmem:[%s6686_s15] ss:$0 sm:$0xff] }
 0x773   :  { %3753 = vadd.xlane.f32.xlu0 %v3752_v32  ;;  %3824 = vmatpush.bf16.msra.mxu3 %v5469_v40 }
 0x777   :  { %3825 = vmatpush.bf16.msra.mxu3 %v5461_v45 }
 0x77b   :  { %4076 = vmatpush.bf16.msrb.mxu3 %v5924_v15 }
 0x77f   :  { %4077 = vmatpush.bf16.msrb.mxu3 %v5923_v16 }
 0x783   :  { %4078 = vmatpush.bf16.msrb.mxu3 %v5922_v17 }
 0x787   :  { %4079 = vmatpush.bf16.msrb.mxu3 %v5921_v19 }
 0x78b   :  { %4080 = vmatpush.bf16.msrb.mxu3 %v5920_v21 }
 0x78f   :  { %4081 = vmatpush.bf16.msrb.mxu3 %v5919_v27 }
 0x7e6   :  { %v3754_v34 = vpop.xlane.xlu0 %3753 }
 0x7e7   :  { %v3755_v35 = vmul.f32 %v3754_v34, %v6042_v22 }
 0x7e9   :  { %v3756_v36 = vsub.f32 %v3751_v31, %v3755_v35 }
 0x7eb   :  { %v3757_v37 = vmul.f32 %v3756_v36, %v3756_v36 }
 0x7ed   :  { %v3758_v5 = vsel %vm175_vm1, %v3757_v37, 0.0 }
 0x7ee   :  { %3759 = vadd.xlane.f32.xlu1 %v3758_v5  ;;  %v5918_v5 = vld [vmem:[%s6695_s19 + $0x8] sm:$0xff] }
 0x7ef   :  { %4082 = vmatpush.bf16.msrb.mxu3 %v5918_v5 }
 0x7f3   :  { %4083 = vmatpush.bf16.msrb.mxu3 %v5917_v18 }
 0x861   :  { %v3760_v33 = vpop.xlane.xlu1 %3759 }
 0x862   :  { %v3761_v49 = vmul.f32 %v3760_v33, %v6042_v22 }
 0x864   :  { %v3762_v52 = vadd.f32 1e-05, %v3761_v49 }
 0x866   :  { %5978 = vrsqrt.f32 %v3762_v52  ;;  %vm3769_vm13 = vweird.f32 %v3762_v52 }
 0x86c   :  { %v5979_v57 = vpop.eup %5978 }
 0x86d   :  { %v3764_v22 = vmul.f32 %v5979_v57, %v3762_v52  ;;  %vm3770_vm12 = vweird.f32 %v5979_v57 }
 0x86e   :  { %vm3771_vm14 = vmor %vm3769_vm13, %vm3770_vm12 }
 0x86f   :  { %v3765_v60 = vmul.f32 %v5979_v57, %v3764_v22 }
 0x871   :  { %v3766_v61 = vmul.f32 0.5, %v3765_v60 }
 0x873   :  { %v3767_v63 = vsub.f32 1.5, %v3766_v61 }
 0x875   :  { %v3768_v0 = vmul.f32 %v5979_v57, %v3767_v63 }
 0x877   :  { %v3772_v2 = vsel %vm3771_vm14, %v5979_v57, %v3768_v0 }
 0x878   :  { %v3773_v4 = vmul.f32 %v3772_v2, %v3756_v36 }
 0x87a   :  { %v3778_v6 = vmul.f32 %v5966_v1, %v3773_v4 }
 0x87c   :  { %v3783_v7 = vadd.f32 %v5967_v3, %v3778_v6 }
 0x87e   :  { %v3784_v8 = vpack.c.bf16 %v3783_v7, %v3783_v7 }
 0x880   :  { %5474 = vmatmul.msk.bf16.vlgmr.msra.gmra.mxu3 %vm175_vm1, %v3784_v8  ;;  %5475 = vmatmul.msk.bf16.vlgmr.msra.gmra.mxu0 %vm175_vm1, %v3784_v8 }
 0x8fd   :  { %v3840_v26 = vpop.f32.mrf.mxu0 }
 0x8fe   :  { %v3841_v28 = vadd.f32 %v3840_v26, %v3792_v24 }
 0x900   :  { %v3845_v10 = vmax.f32 %v3841_v28, 0.0 }
 0x902   :  { %v3847_v30 = vpack.c.bf16 %v3845_v10, %v3845_v10 }
 0x903   :  { %v3827_v31 = vpop.f32.mrf.mxu3 }
 0x904   :  { %v3828_v32 = vadd.f32 %v3827_v31, %v3791_v29  ;;  %4001 = vmatmul.bf16.vlgmr.msrb.gmra.mxu2 %v3847_v30 }
 0x905   :  { %v3842_v34 = vpop.f32.mrf.mxu0 }
 0x906   :  { %v3844_v35 = vmax.f32 %v3828_v32, 0.0 }
 0x908   :  { %v3846_v36 = vpack.c.bf16 %v3844_v35, %v3844_v35 }
 0x90a   :  { %3988 = vmatmul.bf16.vlgmr.msra.gmra.mxu1 %v3846_v36 }
 0x90b   :  { %v3829_v37 = vpop.f32.mrf.mxu3 }
 0x987   :  { %v3989_v39 = vpop.f32.mrf.mxu1  ;;  %v4002_v40 = vpop.f32.mrf.mxu2 }
 0x988   :  { %v3990_v25 = vadd.f32 %v5968_v38, %v3989_v39 }
 0x98a   :  { %v4003_v41 = vadd.f32 %v4002_v40, %v3990_v25 }
 0x98c   :  { %v4006_v42 = vmax.f32 %v4003_v41, 0.0 }
 0x98e   :  { %v4007_v43 = vpack.c.bf16 %v4006_v42, %v4006_v42 }
 0x98f   :  { %v3991_v44 = vpop.f32.mrf.mxu1  ;;  %v4004_v45 = vpop.f32.mrf.mxu2 }
 0x990   :  { %4084 = vmatmul.bf16.vlgmr.msrb.gmra.mxu3 %v4007_v43 }
 0xa13   :  { %v4085_v47 = vpop.f32.mrf.mxu3 }
 0xa14   :  { %v4086_v48 = vadd.f32 %v5969_v46, %v4085_v47 }
 0xa16   :  { %4089 = vst [vmem:[%s4122_s1] sm:$0xff] %v4086_v48 }
 0xa1b   :  { %v4087_v23 = vpop.f32.mrf.mxu3 }

</bundles_post_ra>
